<compile_context>
chip_gen: v7x
topology: tpu7x:2x2x1
jax: 0.10.0
libtpu: 0.0.40
codegen_flags: <defaults>
</compile_context>

<pallas_src>
import functools

import jax
import jax.numpy as jnp
from jax.experimental import pallas as pl
from jax.experimental.pallas import tpu as pltpu


def _encoder_kernel(src_ref, pos_ref,
                    wqk_ref, bqk_ref, wv_ref, bv_ref, wo_ref, bo_ref,
                    w1_ref, b1_ref, w2_ref, b2_ref,
                    n1w_ref, n1b_ref, n2w_ref, n2b_ref,
                    out_ref, x_scratch, pos_scratch, *, nhead, eps=1e-5):
    l = pl.program_id(1)
    num_layers = pl.num_programs(1)

    # Load the input activation / pos_embed once (l == 0); afterwards the
    # running activation lives in the VMEM scratch across the whole layer loop.
    @pl.when(l == 0)
    def _():
        x_scratch[...] = src_ref[0].astype(jnp.float32)
        pos_scratch[...] = pos_ref[0].astype(jnp.float32)

    x = x_scratch[...]                                    # (S, D) f32
    S, D = x.shape
    hd = D // nhead

    qk_in = (x + pos_scratch[...]).astype(jnp.bfloat16)   # bf16 only into the MXU
    xb = x.astype(jnp.bfloat16)

    # ---- full-width fused Q|K projection: (S, D) @ (D, 2D) -----------------
    # 1/sqrt(hd) already folded into the Q half of wqk/bqk host-side.
    qk = jnp.dot(qk_in, wqk_ref[0],
                 preferred_element_type=jnp.float32) + bqk_ref[0]    # (S, 2D)

    # ---- V projection (value = src, no pos_embed): (S, D) @ (D, D) ---------
    v = jnp.dot(xb, wv_ref[0],
                preferred_element_type=jnp.float32) + bv_ref[0]      # (S, D)

    # ---- multi-head attention: head split viewed only here -----------------
    qh = qk[:, :D].reshape(S, nhead, hd).astype(jnp.bfloat16)        # (S, H, hd)
    kh = qk[:, D:].reshape(S, nhead, hd).astype(jnp.bfloat16)        # (S, H, hd)
    vh = v.reshape(S, nhead, hd).astype(jnp.bfloat16)                # (S, H, hd)

    s = jnp.einsum('qhe,khe->hqk', qh, kh,
                   preferred_element_type=jnp.float32)               # (H, S, S)
    s = s - jnp.max(s, axis=-1, keepdims=True)
    p = jnp.exp(s)                                                   # f32 (v5e-safe)
    p = p * pl.reciprocal(jnp.sum(p, axis=-1, keepdims=True), approx=True)
    ctx = jnp.einsum('hqk,khe->qhe', p.astype(jnp.bfloat16), vh,
                     preferred_element_type=jnp.float32)             # (S, H, hd)
    ctx = ctx.reshape(S, D)                                          # heads -> lanes

    # ---- output projection: single full-contraction (S, D) @ (D, D) --------
    attn = jnp.dot(ctx.astype(jnp.bfloat16), wo_ref[0],
                   preferred_element_type=jnp.float32) + bo_ref[0]   # (S, D)

    # ---- residual + LayerNorm1 (post-norm; dropout = identity), f32 --------
    x1 = x + attn
    mu1 = jnp.mean(x1, axis=-1, keepdims=True)
    var1 = jnp.mean((x1 - mu1) ** 2, axis=-1, keepdims=True)
    x1 = (x1 - mu1) * jax.lax.rsqrt(var1 + eps) * n1w_ref[0] + n1b_ref[0]

    # ---- FFN: linear1 -> ReLU -> linear2 ------------------------------------
    h = jnp.dot(x1.astype(jnp.bfloat16), w1_ref[0],
                preferred_element_type=jnp.float32) + b1_ref[0]
    h = jnp.maximum(h, 0.0)
    ffn = jnp.dot(h.astype(jnp.bfloat16), w2_ref[0],
                  preferred_element_type=jnp.float32) + b2_ref[0]

    # ---- residual + LayerNorm2 ----------------------------------------------
    x2 = x1 + ffn
    mu2 = jnp.mean(x2, axis=-1, keepdims=True)
    var2 = jnp.mean((x2 - mu2) ** 2, axis=-1, keepdims=True)
    y = (x2 - mu2) * jax.lax.rsqrt(var2 + eps) * n2w_ref[0] + n2b_ref[0]

    # carry the activation to the next layer; write HBM only once at the end
    x_scratch[...] = y

    @pl.when(l == num_layers - 1)
    def _():
        out_ref[0] = y.astype(out_ref.dtype)


def transformer_encoder(src, pos_embed, packed, nhead):
    """Run the full num_layers encoder stack in ONE pallas_call."""
    B, S, D = src.shape
    L = packed['wqk'].shape[0]
    kernel = functools.partial(_encoder_kernel, nhead=nhead)

    act_spec = pl.BlockSpec((1, S, D), lambda b, l: (b, 0, 0))

    def wspec(arr):
        nd = arr.ndim
        return pl.BlockSpec((1,) + arr.shape[1:],
                            lambda b, l, nd=nd: (l,) + (0,) * (nd - 1))

    names = ['wqk', 'bqk', 'wv', 'bv', 'wo', 'bo',
             'w1', 'b1', 'w2', 'b2', 'n1w', 'n1b', 'n2w', 'n2b']
    in_specs = [act_spec, act_spec] + [wspec(packed[n]) for n in names]

    return pl.pallas_call(
        kernel,
        out_shape=jax.ShapeDtypeStruct((B, S, D), src.dtype),
        grid_spec=pltpu.PrefetchScalarGridSpec(
            num_scalar_prefetch=0,
            grid=(B, L),                      # layer axis last, "arbitrary"
            in_specs=in_specs,
            out_specs=act_spec,
            scratch_shapes=[pltpu.VMEM((S, D), jnp.float32),    # activation carry
                            pltpu.VMEM((S, D), jnp.float32)],   # cached pos_embed
        ),
        compiler_params=pltpu.CompilerParams(
            dimension_semantics=("parallel", "arbitrary"),
            # <= ~48 MiB keeps headroom on v7x (64 MiB physical); well within
            # v5e/v6e's 128 MiB.
            vmem_limit_bytes=48 * 1024 * 1024,
        ),
    )(src, pos_embed, *[packed[n] for n in names])


# ----------------- parameter construction / packing -----------------
def make_layer_params(key, d, nhead, dff):
    """Per-layer params in math layout (x @ W), weights rounded to bf16-exact
    f32 values so kernel (bf16) and reference (f32) use identical weights."""
    ks = jax.random.split(key, 10)
    u = lambda k, shape, bound: jax.random.uniform(k, shape, jnp.float32, -bound, bound)
    in_w = u(ks[0], (3 * d, d), (6.0 / (4.0 * d)) ** 0.5)   # MHA in_proj_weight (3D, D)
    in_b = u(ks[1], (3 * d,), 0.1)                          # in_proj_bias
    out_w = u(ks[2], (d, d), (1.0 / d) ** 0.5)              # out_proj
    out_b = u(ks[3], (d,), (1.0 / d) ** 0.5)
    w1 = u(ks[4], (dff, d), (1.0 / d) ** 0.5)               # linear1 (out, in)
    b1 = u(ks[5], (dff,), (1.0 / d) ** 0.5)
    w2 = u(ks[6], (d, dff), (1.0 / dff) ** 0.5)             # linear2 (out, in)
    b2 = u(ks[7], (d,), (1.0 / dff) ** 0.5)
    n1w = 1.0 + 0.05 * u(ks[8], (d,), 1.0)
    n2w = 1.0 + 0.05 * u(ks[9], (d,), 1.0)
    n1b = jnp.zeros((d,), jnp.float32)
    n2b = jnp.zeros((d,), jnp.float32)

    rb = lambda w: w.astype(jnp.bfloat16).astype(jnp.float32)   # bf16-representable
    return dict(
        wq=rb(in_w[:d].T), bq=in_b[:d].reshape(1, d),
        wk=rb(in_w[d:2 * d].T), bk=in_b[d:2 * d].reshape(1, d),
        wv=rb(in_w[2 * d:].T), bv=in_b[2 * d:].reshape(1, d),
        wo=rb(out_w.T), bo=out_b.reshape(1, d),
        w1=rb(w1.T), b1=b1.reshape(1, dff),
        w2=rb(w2.T), b2=b2.reshape(1, d),
        n1w=n1w.reshape(1, d), n1b=n1b.reshape(1, d),
        n2w=n2w.reshape(1, d), n2b=n2b.reshape(1, d),
    )


def pack_encoder_params(layer_params_list, nhead):
    """Stack per-layer params on a leading L axis, lane-dense 2-D layouts:
      Wq|Wk -> (L, D, 2D)   (Q half pre-scaled by 1/sqrt(hd))
      Wv    -> (L, D, D),  Wo -> (L, D, D)
      W1    -> (L, D, DFF), W2 -> (L, DFF, D)
      biases -> (L, 1, 2D)/(L, 1, D)/(L, 1, DFF)
    Matmul weights are stored in bfloat16 (MXU operands); biases/LN in f32."""
    d = layer_params_list[0]['wq'].shape[0]
    hd = d // nhead
    scale = 1.0 / (hd ** 0.5)     # folded into Wq / bq host-side

    wqk = jnp.stack([jnp.concatenate([p['wq'] * scale, p['wk']], axis=1)
                     for p in layer_params_list])                    # (L, D, 2D)
    bqk = jnp.stack([jnp.concatenate([p['bq'] * scale, p['bk']], axis=1)
                     for p in layer_params_list])                    # (L, 1, 2D)

    st = lambda name: jnp.stack([p[name] for p in layer_params_list])
    return dict(
        wqk=wqk.astype(jnp.bfloat16), bqk=bqk.astype(jnp.float32),
        wv=st('wv').astype(jnp.bfloat16), bv=st('bv').astype(jnp.float32),
        wo=st('wo').astype(jnp.bfloat16), bo=st('bo').astype(jnp.float32),
        w1=st('w1').astype(jnp.bfloat16), b1=st('b1').astype(jnp.float32),
        w2=st('w2').astype(jnp.bfloat16), b2=st('b2').astype(jnp.float32),
        n1w=st('n1w'), n1b=st('n1b'), n2w=st('n2w'), n2b=st('n2b'),
    )


# ----------------- plain-JAX f32 reference for validation -----------------
def _ref_layer(x, pos, p, nhead):
    B, S, D = x.shape
    hd = D // nhead
    qk = x + pos
    q = qk @ p['wq'] + p['bq']
    k = qk @ p['wk'] + p['bk']
    v = x @ p['wv'] + p['bv']
    split = lambda t: t.reshape(B, S, nhead, hd).transpose(0, 2, 1, 3)
    qh, kh, vh = split(q), split(k), split(v)
    s = jnp.einsum('bhqd,bhkd->bhqk', qh, kh) / (hd ** 0.5)
    a = jax.nn.softmax(s, axis=-1)
    ctx = jnp.einsum('bhqk,bhkd->bhqd', a, vh).transpose(0, 2, 1, 3).reshape(B, S, D)
    attn = ctx @ p['wo'] + p['bo']

    def ln(z, w, b):
        mu = z.mean(-1, keepdims=True)
        var = ((z - mu) ** 2).mean(-1, keepdims=True)
        return (z - mu) / jnp.sqrt(var + 1e-5) * w + b

    x1 = ln(x + attn, p['n1w'], p['n1b'])
    h = jnp.maximum(x1 @ p['w1'] + p['b1'], 0.0)
    return ln(x1 + h @ p['w2'] + p['b2'], p['n2w'], p['n2b'])


def _ref_encoder(src, pos, layer_params_list, nhead):
    out = src
    for p in layer_params_list:
        out = _ref_layer(out, pos, p, nhead)
    return out


if __name__ == "__main__":
    # hd = D / NHEAD = 16 -> 1/sqrt(hd) = 0.25 is a power of two, so folding the
    # scale into Wq keeps the bf16 weights exactly equal to the f32 reference's.
    B, S, D = 2, 8, 32
    NHEAD, DFF, NUM_LAYERS = 2, 64, 2

    key = jax.random.PRNGKey(0)
    keys = jax.random.split(key, NUM_LAYERS + 2)
    src = jax.random.normal(keys[0], (B, S, D), jnp.float32)
    pos_embed = jax.random.normal(keys[1], (B, S, D), jnp.float32)
    layer_params = [make_layer_params(keys[2 + i], D, NHEAD, DFF)
                    for i in range(NUM_LAYERS)]
    packed = pack_encoder_params(layer_params, NHEAD)

    out = transformer_encoder(src, pos_embed, packed, NHEAD)
    out = jax.block_until_ready(out)

    ref = _ref_encoder(src, pos_embed, layer_params, NHEAD)
    assert out.shape == (B, S, D), out.shape
    # Weights are bf16-exact in both paths, so the kernel/reference gap comes
    # only from bf16 activation rounding at the MXU (f32 accumulation) and the
    # approx softmax reciprocal, compounded over NUM_LAYERS layers.
    err_max = float(jnp.max(jnp.abs(out - ref)))
    err_rel = float(jnp.linalg.norm(out - ref) / jnp.linalg.norm(ref))
    assert err_rel < 2e-2 and err_max < 1e-1, \
        f"error vs f32 reference too large: max={err_max}, rel_l2={err_rel}"
    print("KERNEL_OK")
</pallas_src>

<mosaic_0001>
module attributes {stable_mosaic.version = 11 : i64} {
  func.func @_encoder_kernel(%arg0: i32, %arg1: i32, %arg2: memref<1x8x32xf32, #tpu.memory_space<vmem>>, %arg3: memref<1x8x32xf32, #tpu.memory_space<vmem>>, %arg4: memref<1x32x64xbf16, #tpu.memory_space<vmem>>, %arg5: memref<1x1x64xf32, #tpu.memory_space<vmem>>, %arg6: memref<1x32x32xbf16, #tpu.memory_space<vmem>>, %arg7: memref<1x1x32xf32, #tpu.memory_space<vmem>>, %arg8: memref<1x32x32xbf16, #tpu.memory_space<vmem>>, %arg9: memref<1x1x32xf32, #tpu.memory_space<vmem>>, %arg10: memref<1x32x64xbf16, #tpu.memory_space<vmem>>, %arg11: memref<1x1x64xf32, #tpu.memory_space<vmem>>, %arg12: memref<1x64x32xbf16, #tpu.memory_space<vmem>>, %arg13: memref<1x1x32xf32, #tpu.memory_space<vmem>>, %arg14: memref<1x1x32xf32, #tpu.memory_space<vmem>>, %arg15: memref<1x1x32xf32, #tpu.memory_space<vmem>>, %arg16: memref<1x1x32xf32, #tpu.memory_space<vmem>>, %arg17: memref<1x1x32xf32, #tpu.memory_space<vmem>>, %arg18: memref<1x8x32xf32, #tpu.memory_space<vmem>>, %arg19: memref<8x32xf32, #tpu.memory_space<vmem>>, %arg20: memref<8x32xf32, #tpu.memory_space<vmem>>) attributes {dimension_semantics = [#tpu.dimension_semantics<parallel>, #tpu.dimension_semantics<arbitrary>], iteration_bounds = array<i64: 2, 2>, scalar_prefetch = 0 : i64, scratch_operands = 2 : i64, tpu.core_type = #tpu.core_type<tc>, window_params = [{transform_indices = @transform_0, window_bounds = array<i64: 1, 8, 32>}, {transform_indices = @transform_1, window_bounds = array<i64: 1, 8, 32>}, {transform_indices = @transform_2, window_bounds = array<i64: 1, 32, 64>}, {transform_indices = @transform_3, window_bounds = array<i64: 1, 1, 64>}, {transform_indices = @transform_4, window_bounds = array<i64: 1, 32, 32>}, {transform_indices = @transform_5, window_bounds = array<i64: 1, 1, 32>}, {transform_indices = @transform_6, window_bounds = array<i64: 1, 32, 32>}, {transform_indices = @transform_7, window_bounds = array<i64: 1, 1, 32>}, {transform_indices = @transform_8, window_bounds = array<i64: 1, 32, 64>}, {transform_indices = @transform_9, window_bounds = array<i64: 1, 1, 64>}, {transform_indices = @transform_10, window_bounds = array<i64: 1, 64, 32>}, {transform_indices = @transform_11, window_bounds = array<i64: 1, 1, 32>}, {transform_indices = @transform_12, window_bounds = array<i64: 1, 1, 32>}, {transform_indices = @transform_13, window_bounds = array<i64: 1, 1, 32>}, {transform_indices = @transform_14, window_bounds = array<i64: 1, 1, 32>}, {transform_indices = @transform_15, window_bounds = array<i64: 1, 1, 32>}, {transform_indices = @transform_16, window_bounds = array<i64: 1, 8, 32>}]} {
    %c0_i32 = arith.constant 0 : i32
    %0 = arith.cmpi eq, %arg1, %c0_i32 : i32
    %1 = arith.extui %0 : i1 to i32
    %c0_i32_0 = arith.constant 0 : i32
    %2 = arith.cmpi ne, %1, %c0_i32_0 : i32
    scf.if %2 {
      %c0_68 = arith.constant 0 : index
      %c0_69 = arith.constant 0 : index
      %c0_70 = arith.constant 0 : index
      %129 = vector.load %arg2[%c0_68, %c0_69, %c0_70] : memref<1x8x32xf32, #tpu.memory_space<vmem>>, vector<1x8x32xf32>
      %130 = vector.shape_cast %129 : vector<1x8x32xf32> to vector<8x32xf32>
      %c0_71 = arith.constant 0 : index
      %c0_72 = arith.constant 0 : index
      %131 = vector.load %arg19[%c0_71, %c0_72] : memref<8x32xf32, #tpu.memory_space<vmem>>, vector<8x32xf32>
      tpu.vector_store %arg19[%c0_71, %c0_72], %130 {strides = array<i32>} : memref<8x32xf32, #tpu.memory_space<vmem>>, vector<8x32xf32>,
      %c0_73 = arith.constant 0 : index
      %c0_74 = arith.constant 0 : index
      %c0_75 = arith.constant 0 : index
      %132 = vector.load %arg3[%c0_73, %c0_74, %c0_75] : memref<1x8x32xf32, #tpu.memory_space<vmem>>, vector<1x8x32xf32>
      %133 = vector.shape_cast %132 : vector<1x8x32xf32> to vector<8x32xf32>
      %c0_76 = arith.constant 0 : index
      %c0_77 = arith.constant 0 : index
      %134 = vector.load %arg20[%c0_76, %c0_77] : memref<8x32xf32, #tpu.memory_space<vmem>>, vector<8x32xf32>
      tpu.vector_store %arg20[%c0_76, %c0_77], %133 {strides = array<i32>} : memref<8x32xf32, #tpu.memory_space<vmem>>, vector<8x32xf32>,
    } else {
    }
    %c0 = arith.constant 0 : index
    %c0_1 = arith.constant 0 : index
    %3 = vector.load %arg19[%c0, %c0_1] : memref<8x32xf32, #tpu.memory_space<vmem>>, vector<8x32xf32>
    %c0_2 = arith.constant 0 : index
    %c0_3 = arith.constant 0 : index
    %4 = vector.load %arg20[%c0_2, %c0_3] : memref<8x32xf32, #tpu.memory_space<vmem>>, vector<8x32xf32>
    %5 = arith.addf %3, %4 : vector<8x32xf32>
    %6 = arith.truncf %5 : vector<8x32xf32> to vector<8x32xbf16>
    %7 = arith.truncf %3 : vector<8x32xf32> to vector<8x32xbf16>
    %c0_4 = arith.constant 0 : index
    %c0_5 = arith.constant 0 : index
    %c0_6 = arith.constant 0 : index
    %8 = vector.load %arg4[%c0_4, %c0_5, %c0_6] : memref<1x32x64xbf16, #tpu.memory_space<vmem>>, vector<1x32x64xbf16>
    %9 = vector.shape_cast %8 : vector<1x32x64xbf16> to vector<32x64xbf16>
    %cst = arith.constant dense<0.000000e+00> : vector<8x64xf32>
    %10 = tpu.matmul %6, %9, %cst {dimension_numbers = #tpu.dot_dimension_numbers<[1], [0], [0], [1], [0, 0, 1, 1], [], []>} : vector<8x32xbf16>, vector<32x64xbf16>, vector<8x64xf32> -> vector<8x64xf32>
    %c0_7 = arith.constant 0 : index
    %c0_8 = arith.constant 0 : index
    %c0_9 = arith.constant 0 : index
    %11 = vector.load %arg5[%c0_7, %c0_8, %c0_9] : memref<1x1x64xf32, #tpu.memory_space<vmem>>, vector<1x1x64xf32>
    %12 = vector.shape_cast %11 : vector<1x1x64xf32> to vector<1x64xf32>
    %13 = vector.broadcast %12 : vector<1x64xf32> to vector<8x64xf32>
    %14 = arith.addf %10, %13 : vector<8x64xf32>
    %c0_10 = arith.constant 0 : index
    %c0_11 = arith.constant 0 : index
    %c0_12 = arith.constant 0 : index
    %15 = vector.load %arg6[%c0_10, %c0_11, %c0_12] : memref<1x32x32xbf16, #tpu.memory_space<vmem>>, vector<1x32x32xbf16>
    %16 = vector.shape_cast %15 : vector<1x32x32xbf16> to vector<32x32xbf16>
    %cst_13 = arith.constant dense<0.000000e+00> : vector<8x32xf32>
    %17 = tpu.matmul %7, %16, %cst_13 {dimension_numbers = #tpu.dot_dimension_numbers<[1], [0], [0], [1], [0, 0, 1, 1], [], []>} : vector<8x32xbf16>, vector<32x32xbf16>, vector<8x32xf32> -> vector<8x32xf32>
    %c0_14 = arith.constant 0 : index
    %c0_15 = arith.constant 0 : index
    %c0_16 = arith.constant 0 : index
    %18 = vector.load %arg7[%c0_14, %c0_15, %c0_16] : memref<1x1x32xf32, #tpu.memory_space<vmem>>, vector<1x1x32xf32>
    %19 = vector.shape_cast %18 : vector<1x1x32xf32> to vector<1x32xf32>
    %20 = vector.broadcast %19 : vector<1x32xf32> to vector<8x32xf32>
    %21 = arith.addf %17, %20 : vector<8x32xf32>
    %22 = vector.extract_strided_slice %14 {offsets = [0, 0], sizes = [8, 32], strides = [1, 1]} : vector<8x64xf32> to vector<8x32xf32>
    %23 = vector.shape_cast %22 : vector<8x32xf32> to vector<8x2x16xf32>
    %24 = arith.truncf %23 : vector<8x2x16xf32> to vector<8x2x16xbf16>
    %25 = vector.extract_strided_slice %14 {offsets = [0, 32], sizes = [8, 32], strides = [1, 1]} : vector<8x64xf32> to vector<8x32xf32>
    %26 = vector.shape_cast %25 : vector<8x32xf32> to vector<8x2x16xf32>
    %27 = arith.truncf %26 : vector<8x2x16xf32> to vector<8x2x16xbf16>
    %28 = vector.shape_cast %21 : vector<8x32xf32> to vector<8x2x16xf32>
    %29 = arith.truncf %28 : vector<8x2x16xf32> to vector<8x2x16xbf16>
    "tpu.trace_start"() <{level = 10 : i32, message = "qhe,khe->hqk"}> : () -> ()
    %cst_17 = arith.constant dense<0.000000e+00> : vector<2x8x8xf32>
    %30 = tpu.matmul %24, %27, %cst_17 {dimension_numbers = #tpu.dot_dimension_numbers<[2], [2], [0], [0], [0, 1, 0, 0, 1, 0], [1], [1]>} : vector<8x2x16xbf16>, vector<8x2x16xbf16>, vector<2x8x8xf32> -> vector<2x8x8xf32>
    "tpu.trace_stop"() : () -> ()
    %cst_18 = arith.constant dense<0xFF800000> : vector<2x8xf32>
    %31 = vector.multi_reduction <maximumf>, %30, %cst_18 [2] : vector<2x8x8xf32> to vector<2x8xf32>
    %32 = vector.shape_cast %31 : vector<2x8xf32> to vector<2x8x1xf32>
    %33 = vector.broadcast %32 : vector<2x8x1xf32> to vector<2x8x8xf32>
    %34 = arith.subf %30, %33 : vector<2x8x8xf32>
    %35 = math.exp %34 : vector<2x8x8xf32>
    %cst_19 = arith.constant dense<0.000000e+00> : vector<2x8xf32>
    %36 = vector.multi_reduction <add>, %35, %cst_19 [2] : vector<2x8x8xf32> to vector<2x8xf32>
    %37 = vector.shape_cast %36 : vector<2x8xf32> to vector<2x8x1xf32>
    %38 = tpu.reciprocal %37 {approx = true} : vector<2x8x1xf32> -> vector<2x8x1xf32>
    %39 = vector.broadcast %38 : vector<2x8x1xf32> to vector<2x8x8xf32>
    %40 = arith.mulf %35, %39 : vector<2x8x8xf32>
    %41 = arith.truncf %40 : vector<2x8x8xf32> to vector<2x8x8xbf16>
    "tpu.trace_start"() <{level = 10 : i32, message = "hqk,khe->qhe"}> : () -> ()
    %cst_20 = arith.constant dense<0.000000e+00> : vector<2x16x8xf32>
    %42 = tpu.matmul %29, %41, %cst_20 {dimension_numbers = #tpu.dot_dimension_numbers<[0], [2], [2], [1], [0, 1, 0, 2, 1, 1], [1], [0]>} : vector<8x2x16xbf16>, vector<2x8x8xbf16>, vector<2x16x8xf32> -> vector<2x16x8xf32>
    %43 = tpu.transpose %42, [2, 0, 1] : vector<2x16x8xf32> -> vector<8x2x16xf32>
    "tpu.trace_stop"() : () -> ()
    %44 = vector.shape_cast %43 : vector<8x2x16xf32> to vector<8x32xf32>
    %45 = arith.truncf %44 : vector<8x32xf32> to vector<8x32xbf16>
    %c0_21 = arith.constant 0 : index
    %c0_22 = arith.constant 0 : index
    %c0_23 = arith.constant 0 : index
    %46 = vector.load %arg8[%c0_21, %c0_22, %c0_23] : memref<1x32x32xbf16, #tpu.memory_space<vmem>>, vector<1x32x32xbf16>
    %47 = vector.shape_cast %46 : vector<1x32x32xbf16> to vector<32x32xbf16>
    %cst_24 = arith.constant dense<0.000000e+00> : vector<8x32xf32>
    %48 = tpu.matmul %45, %47, %cst_24 {dimension_numbers = #tpu.dot_dimension_numbers<[1], [0], [0], [1], [0, 0, 1, 1], [], []>} : vector<8x32xbf16>, vector<32x32xbf16>, vector<8x32xf32> -> vector<8x32xf32>
    %c0_25 = arith.constant 0 : index
    %c0_26 = arith.constant 0 : index
    %c0_27 = arith.constant 0 : index
    %49 = vector.load %arg9[%c0_25, %c0_26, %c0_27] : memref<1x1x32xf32, #tpu.memory_space<vmem>>, vector<1x1x32xf32>
    %50 = vector.shape_cast %49 : vector<1x1x32xf32> to vector<1x32xf32>
    %51 = vector.broadcast %50 : vector<1x32xf32> to vector<8x32xf32>
    %52 = arith.addf %48, %51 : vector<8x32xf32>
    %53 = arith.addf %3, %52 : vector<8x32xf32>
    %cst_28 = arith.constant dense<0.000000e+00> : vector<8xf32>
    %54 = vector.multi_reduction <add>, %53, %cst_28 [1] : vector<8x32xf32> to vector<8xf32>
    %55 = vector.shape_cast %54 : vector<8xf32> to vector<8x1xf32>
    %cst_29 = arith.constant 3.200000e+01 : f32
    %56 = vector.broadcast %cst_29 : f32 to vector<8x1xf32>
    %57 = arith.divf %55, %56 : vector<8x1xf32>
    %58 = vector.broadcast %57 : vector<8x1xf32> to vector<8x32xf32>
    %59 = arith.subf %53, %58 : vector<8x32xf32>
    %60 = arith.mulf %59, %59 : vector<8x32xf32>
    %cst_30 = arith.constant dense<0.000000e+00> : vector<8xf32>
    %61 = vector.multi_reduction <add>, %60, %cst_30 [1] : vector<8x32xf32> to vector<8xf32>
    %62 = vector.shape_cast %61 : vector<8xf32> to vector<8x1xf32>
    %cst_31 = arith.constant 3.200000e+01 : f32
    %63 = vector.broadcast %cst_31 : f32 to vector<8x1xf32>
    %64 = arith.divf %62, %63 : vector<8x1xf32>
    %65 = vector.broadcast %57 : vector<8x1xf32> to vector<8x32xf32>
    %66 = arith.subf %53, %65 : vector<8x32xf32>
    %cst_32 = arith.constant 9.99999974E-6 : f32
    %67 = vector.broadcast %cst_32 : f32 to vector<8x1xf32>
    %68 = arith.addf %64, %67 : vector<8x1xf32>
    %69 = math.rsqrt %68 : vector<8x1xf32>
    %70 = vector.broadcast %69 : vector<8x1xf32> to vector<8x32xf32>
    %71 = arith.mulf %66, %70 : vector<8x32xf32>
    %c0_33 = arith.constant 0 : index
    %c0_34 = arith.constant 0 : index
    %c0_35 = arith.constant 0 : index
    %72 = vector.load %arg14[%c0_33, %c0_34, %c0_35] : memref<1x1x32xf32, #tpu.memory_space<vmem>>, vector<1x1x32xf32>
    %73 = vector.shape_cast %72 : vector<1x1x32xf32> to vector<1x32xf32>
    %74 = vector.broadcast %73 : vector<1x32xf32> to vector<8x32xf32>
    %75 = arith.mulf %71, %74 : vector<8x32xf32>
    %c0_36 = arith.constant 0 : index
    %c0_37 = arith.constant 0 : index
    %c0_38 = arith.constant 0 : index
    %76 = vector.load %arg15[%c0_36, %c0_37, %c0_38] : memref<1x1x32xf32, #tpu.memory_space<vmem>>, vector<1x1x32xf32>
    %77 = vector.shape_cast %76 : vector<1x1x32xf32> to vector<1x32xf32>
    %78 = vector.broadcast %77 : vector<1x32xf32> to vector<8x32xf32>
    %79 = arith.addf %75, %78 : vector<8x32xf32>
    %80 = arith.truncf %79 : vector<8x32xf32> to vector<8x32xbf16>
    %c0_39 = arith.constant 0 : index
    %c0_40 = arith.constant 0 : index
    %c0_41 = arith.constant 0 : index
    %81 = vector.load %arg10[%c0_39, %c0_40, %c0_41] : memref<1x32x64xbf16, #tpu.memory_space<vmem>>, vector<1x32x64xbf16>
    %82 = vector.shape_cast %81 : vector<1x32x64xbf16> to vector<32x64xbf16>
    %cst_42 = arith.constant dense<0.000000e+00> : vector<8x64xf32>
    %83 = tpu.matmul %80, %82, %cst_42 {dimension_numbers = #tpu.dot_dimension_numbers<[1], [0], [0], [1], [0, 0, 1, 1], [], []>} : vector<8x32xbf16>, vector<32x64xbf16>, vector<8x64xf32> -> vector<8x64xf32>
    %c0_43 = arith.constant 0 : index
    %c0_44 = arith.constant 0 : index
    %c0_45 = arith.constant 0 : index
    %84 = vector.load %arg11[%c0_43, %c0_44, %c0_45] : memref<1x1x64xf32, #tpu.memory_space<vmem>>, vector<1x1x64xf32>
    %85 = vector.shape_cast %84 : vector<1x1x64xf32> to vector<1x64xf32>
    %86 = vector.broadcast %85 : vector<1x64xf32> to vector<8x64xf32>
    %87 = arith.addf %83, %86 : vector<8x64xf32>
    %cst_46 = arith.constant 0.000000e+00 : f32
    %88 = vector.broadcast %cst_46 : f32 to vector<8x64xf32>
    %89 = arith.maximumf %87, %88 : vector<8x64xf32>
    %90 = arith.truncf %89 : vector<8x64xf32> to vector<8x64xbf16>
    %c0_47 = arith.constant 0 : index
    %c0_48 = arith.constant 0 : index
    %c0_49 = arith.constant 0 : index
    %91 = vector.load %arg12[%c0_47, %c0_48, %c0_49] : memref<1x64x32xbf16, #tpu.memory_space<vmem>>, vector<1x64x32xbf16>
    %92 = vector.shape_cast %91 : vector<1x64x32xbf16> to vector<64x32xbf16>
    %cst_50 = arith.constant dense<0.000000e+00> : vector<8x32xf32>
    %93 = tpu.matmul %90, %92, %cst_50 {dimension_numbers = #tpu.dot_dimension_numbers<[1], [0], [0], [1], [0, 0, 1, 1], [], []>} : vector<8x64xbf16>, vector<64x32xbf16>, vector<8x32xf32> -> vector<8x32xf32>
    %c0_51 = arith.constant 0 : index
    %c0_52 = arith.constant 0 : index
    %c0_53 = arith.constant 0 : index
    %94 = vector.load %arg13[%c0_51, %c0_52, %c0_53] : memref<1x1x32xf32, #tpu.memory_space<vmem>>, vector<1x1x32xf32>
    %95 = vector.shape_cast %94 : vector<1x1x32xf32> to vector<1x32xf32>
    %96 = vector.broadcast %95 : vector<1x32xf32> to vector<8x32xf32>
    %97 = arith.addf %93, %96 : vector<8x32xf32>
    %98 = arith.addf %79, %97 : vector<8x32xf32>
    %cst_54 = arith.constant dense<0.000000e+00> : vector<8xf32>
    %99 = vector.multi_reduction <add>, %98, %cst_54 [1] : vector<8x32xf32> to vector<8xf32>
    %100 = vector.shape_cast %99 : vector<8xf32> to vector<8x1xf32>
    %cst_55 = arith.constant 3.200000e+01 : f32
    %101 = vector.broadcast %cst_55 : f32 to vector<8x1xf32>
    %102 = arith.divf %100, %101 : vector<8x1xf32>
    %103 = vector.broadcast %102 : vector<8x1xf32> to vector<8x32xf32>
    %104 = arith.subf %98, %103 : vector<8x32xf32>
    %105 = arith.mulf %104, %104 : vector<8x32xf32>
    %cst_56 = arith.constant dense<0.000000e+00> : vector<8xf32>
    %106 = vector.multi_reduction <add>, %105, %cst_56 [1] : vector<8x32xf32> to vector<8xf32>
    %107 = vector.shape_cast %106 : vector<8xf32> to vector<8x1xf32>
    %cst_57 = arith.constant 3.200000e+01 : f32
    %108 = vector.broadcast %cst_57 : f32 to vector<8x1xf32>
    %109 = arith.divf %107, %108 : vector<8x1xf32>
    %110 = vector.broadcast %102 : vector<8x1xf32> to vector<8x32xf32>
    %111 = arith.subf %98, %110 : vector<8x32xf32>
    %cst_58 = arith.constant 9.99999974E-6 : f32
    %112 = vector.broadcast %cst_58 : f32 to vector<8x1xf32>
    %113 = arith.addf %109, %112 : vector<8x1xf32>
    %114 = math.rsqrt %113 : vector<8x1xf32>
    %115 = vector.broadcast %114 : vector<8x1xf32> to vector<8x32xf32>
    %116 = arith.mulf %111, %115 : vector<8x32xf32>
    %c0_59 = arith.constant 0 : index
    %c0_60 = arith.constant 0 : index
    %c0_61 = arith.constant 0 : index
    %117 = vector.load %arg16[%c0_59, %c0_60, %c0_61] : memref<1x1x32xf32, #tpu.memory_space<vmem>>, vector<1x1x32xf32>
    %118 = vector.shape_cast %117 : vector<1x1x32xf32> to vector<1x32xf32>
    %119 = vector.broadcast %118 : vector<1x32xf32> to vector<8x32xf32>
    %120 = arith.mulf %116, %119 : vector<8x32xf32>
    %c0_62 = arith.constant 0 : index
    %c0_63 = arith.constant 0 : index
    %c0_64 = arith.constant 0 : index
    %121 = vector.load %arg17[%c0_62, %c0_63, %c0_64] : memref<1x1x32xf32, #tpu.memory_space<vmem>>, vector<1x1x32xf32>
    %122 = vector.shape_cast %121 : vector<1x1x32xf32> to vector<1x32xf32>
    %123 = vector.broadcast %122 : vector<1x32xf32> to vector<8x32xf32>
    %124 = arith.addf %120, %123 : vector<8x32xf32>
    %c0_65 = arith.constant 0 : index
    %c0_66 = arith.constant 0 : index
    %125 = vector.load %arg19[%c0_65, %c0_66] : memref<8x32xf32, #tpu.memory_space<vmem>>, vector<8x32xf32>
    tpu.vector_store %arg19[%c0_65, %c0_66], %124 {strides = array<i32>} : memref<8x32xf32, #tpu.memory_space<vmem>>, vector<8x32xf32>,
    %c1_i32 = arith.constant 1 : i32
    %126 = arith.cmpi eq, %arg1, %c1_i32 : i32
    %127 = arith.extui %126 : i1 to i32
    %c0_i32_67 = arith.constant 0 : i32
    %128 = arith.cmpi ne, %127, %c0_i32_67 : i32
    scf.if %128 {
      %c0_68 = arith.constant 0 : index
      %c0_69 = arith.constant 0 : index
      %c0_70 = arith.constant 0 : index
      %129 = vector.load %arg18[%c0_68, %c0_69, %c0_70] : memref<1x8x32xf32, #tpu.memory_space<vmem>>, vector<1x8x32xf32>
      %130 = vector.shape_cast %129 : vector<1x8x32xf32> to vector<8x32xf32>
      %131 = vector.shape_cast %124 : vector<8x32xf32> to vector<1x8x32xf32>
      tpu.vector_store %arg18[%c0_68, %c0_69, %c0_70], %131 {strides = array<i32>} : memref<1x8x32xf32, #tpu.memory_space<vmem>>, vector<1x8x32xf32>,
    } else {
    }
    return
  }
  func.func @transform_0(%arg0: i32, %arg1: i32) -> (i32, i32, i32) {
    %c0_i32 = arith.constant 0 : i32
    %c0_i32_0 = arith.constant 0 : i32
    %c0_i32_1 = arith.constant 0 : i32
    return %arg0, %c0_i32, %c0_i32_0 : i32, i32, i32
  }
  func.func @transform_1(%arg0: i32, %arg1: i32) -> (i32, i32, i32) {
    %c0_i32 = arith.constant 0 : i32
    %c0_i32_0 = arith.constant 0 : i32
    %c0_i32_1 = arith.constant 0 : i32
    return %arg0, %c0_i32, %c0_i32_0 : i32, i32, i32
  }
  func.func @transform_2(%arg0: i32, %arg1: i32) -> (i32, i32, i32) {
    %c0_i32 = arith.constant 0 : i32
    %c0_i32_0 = arith.constant 0 : i32
    %c0_i32_1 = arith.constant 0 : i32
    return %arg1, %c0_i32, %c0_i32_0 : i32, i32, i32
  }
  func.func @transform_3(%arg0: i32, %arg1: i32) -> (i32, i32, i32) {
    %c0_i32 = arith.constant 0 : i32
    %c0_i32_0 = arith.constant 0 : i32
    %c0_i32_1 = arith.constant 0 : i32
    return %arg1, %c0_i32, %c0_i32_0 : i32, i32, i32
  }
  func.func @transform_4(%arg0: i32, %arg1: i32) -> (i32, i32, i32) {
    %c0_i32 = arith.constant 0 : i32
    %c0_i32_0 = arith.constant 0 : i32
    %c0_i32_1 = arith.constant 0 : i32
    return %arg1, %c0_i32, %c0_i32_0 : i32, i32, i32
  }
  func.func @transform_5(%arg0: i32, %arg1: i32) -> (i32, i32, i32) {
    %c0_i32 = arith.constant 0 : i32
    %c0_i32_0 = arith.constant 0 : i32
    %c0_i32_1 = arith.constant 0 : i32
    return %arg1, %c0_i32, %c0_i32_0 : i32, i32, i32
  }
  func.func @transform_6(%arg0: i32, %arg1: i32) -> (i32, i32, i32) {
    %c0_i32 = arith.constant 0 : i32
    %c0_i32_0 = arith.constant 0 : i32
    %c0_i32_1 = arith.constant 0 : i32
    return %arg1, %c0_i32, %c0_i32_0 : i32, i32, i32
  }
  func.func @transform_7(%arg0: i32, %arg1: i32) -> (i32, i32, i32) {
    %c0_i32 = arith.constant 0 : i32
    %c0_i32_0 = arith.constant 0 : i32
    %c0_i32_1 = arith.constant 0 : i32
    return %arg1, %c0_i32, %c0_i32_0 : i32, i32, i32
  }
  func.func @transform_8(%arg0: i32, %arg1: i32) -> (i32, i32, i32) {
    %c0_i32 = arith.constant 0 : i32
    %c0_i32_0 = arith.constant 0 : i32
    %c0_i32_1 = arith.constant 0 : i32
    return %arg1, %c0_i32, %c0_i32_0 : i32, i32, i32
  }
  func.func @transform_9(%arg0: i32, %arg1: i32) -> (i32, i32, i32) {
    %c0_i32 = arith.constant 0 : i32
    %c0_i32_0 = arith.constant 0 : i32
    %c0_i32_1 = arith.constant 0 : i32
    return %arg1, %c0_i32, %c0_i32_0 : i32, i32, i32
  }
  func.func @transform_10(%arg0: i32, %arg1: i32) -> (i32, i32, i32) {
    %c0_i32 = arith.constant 0 : i32
    %c0_i32_0 = arith.constant 0 : i32
    %c0_i32_1 = arith.constant 0 : i32
    return %arg1, %c0_i32, %c0_i32_0 : i32, i32, i32
  }
  func.func @transform_11(%arg0: i32, %arg1: i32) -> (i32, i32, i32) {
    %c0_i32 = arith.constant 0 : i32
    %c0_i32_0 = arith.constant 0 : i32
    %c0_i32_1 = arith.constant 0 : i32
    return %arg1, %c0_i32, %c0_i32_0 : i32, i32, i32
  }
  func.func @transform_12(%arg0: i32, %arg1: i32) -> (i32, i32, i32) {
    %c0_i32 = arith.constant 0 : i32
    %c0_i32_0 = arith.constant 0 : i32
    %c0_i32_1 = arith.constant 0 : i32
    return %arg1, %c0_i32, %c0_i32_0 : i32, i32, i32
  }
  func.func @transform_13(%arg0: i32, %arg1: i32) -> (i32, i32, i32) {
    %c0_i32 = arith.constant 0 : i32
    %c0_i32_0 = arith.constant 0 : i32
    %c0_i32_1 = arith.constant 0 : i32
    return %arg1, %c0_i32, %c0_i32_0 : i32, i32, i32
  }
  func.func @transform_14(%arg0: i32, %arg1: i32) -> (i32, i32, i32) {
    %c0_i32 = arith.constant 0 : i32
    %c0_i32_0 = arith.constant 0 : i32
    %c0_i32_1 = arith.constant 0 : i32
    return %arg1, %c0_i32, %c0_i32_0 : i32, i32, i32
  }
  func.func @transform_15(%arg0: i32, %arg1: i32) -> (i32, i32, i32) {
    %c0_i32 = arith.constant 0 : i32
    %c0_i32_0 = arith.constant 0 : i32
    %c0_i32_1 = arith.constant 0 : i32
    return %arg1, %c0_i32, %c0_i32_0 : i32, i32, i32
  }
  func.func @transform_16(%arg0: i32, %arg1: i32) -> (i32, i32, i32) {
    %c0_i32 = arith.constant 0 : i32
    %c0_i32_0 = arith.constant 0 : i32
    %c0_i32_1 = arith.constant 0 : i32
    return %arg0, %c0_i32, %c0_i32_0 : i32, i32, i32
  }
}

</mosaic_0001>

<bundles_post_ra>
// kernel: tpu_custom_call.1
= control target key start
LH: loop header
LB: loop body
LE: loop exit
PB: predicated region body
PF: predicated region fallthrough
CT: control target
= control target key end

     0   :  { %s5046_s0 = inlined_call_operand.hbm [shape: f32[2,8,32], index: 0, kind: input, shape index: {}]   ;;  %s5047_s1 = inlined_call_operand.hbm [shape: f32[2,8,32], index: 1, kind: input, shape index: {}]   ;;  %s5048_s2 = inlined_call_operand.vmem [shape: bf16[2,32,64], index: 2, kind: input, shape index: {}]   ;;  %s5049_s3 = inlined_call_operand.vmem [shape: f32[2,1,64], index: 3, kind: input, shape index: {}]   ;;  %s5050_s4 = inlined_call_operand.vmem [shape: bf16[2,32,32], index: 4, kind: input, shape index: {}]   ;;  %s5051_s5 = inlined_call_operand.vmem [shape: f32[2,1,32], index: 5, kind: input, shape index: {}]   ;;  %s5052_s6 = inlined_call_operand.vmem [shape: bf16[2,32,32], index: 6, kind: input, shape index: {}]   ;;  %s5053_s7 = inlined_call_operand.hbm [shape: f32[2,1,32], index: 7, kind: input, shape index: {}]   ;;  %s5054_s8 = inlined_call_operand.hbm [shape: bf16[2,32,64], index: 8, kind: input, shape index: {}]   ;;  %s5055_s9 = inlined_call_operand.hbm [shape: f32[2,1,64], index: 9, kind: input, shape index: {}]   ;;  %s5056_s10 = inlined_call_operand.vmem [shape: bf16[2,64,32], index: 10, kind: input, shape index: {}]   ;;  %s5057_s11 = inlined_call_operand.vmem [shape: f32[2,1,32], index: 11, kind: input, shape index: {}]   ;;  %s5058_s12 = inlined_call_operand.vmem [shape: f32[2,1,32], index: 12, kind: input, shape index: {}]   ;;  %s5059_s13 = inlined_call_operand.vmem [shape: f32[2,1,32], index: 13, kind: input, shape index: {}]   ;;  %s5060_s14 = inlined_call_operand.vmem [shape: f32[2,1,32], index: 14, kind: input, shape index: {}]   ;;  %s5061_s15 = inlined_call_operand.vmem [shape: f32[2,1,32], index: 15, kind: input, shape index: {}]   ;;  %s5062_s16 = inlined_call_operand.hbm [shape: f32[2,8,32], index: 16, kind: output, shape index: {}]  }
   0x1   :  { %5097 = sst [smem:[#allocation36_spill]] %s5046_s0 }
   0x2   :  { %5098 = sst [smem:[#allocation37_spill]] %s5047_s1 }
   0x3   :  { %5099 = sst [smem:[#allocation38_spill]] %s5048_s2 }
   0x4   :  { %5100 = sst [smem:[#allocation39_spill]] %s5049_s3 }
   0x5   :  { %5101 = sst [smem:[#allocation40_spill]] %s5050_s4 }
   0x6   :  { %5102 = sst [smem:[#allocation41_spill]] %s5051_s5 }
   0x7   :  { %5103 = sst [smem:[#allocation42_spill]] %s5052_s6 }
   0x8   :  { %5104 = sst [smem:[#allocation43_spill]] %s5053_s7 }
   0x9   :  { %5105 = sst [smem:[#allocation44_spill]] %s5054_s8 }
   0xa   :  { %5106 = sst [smem:[#allocation45_spill]] %s5055_s9 }
   0xb   :  { %5107 = sst [smem:[#allocation46_spill]] %s5056_s10 }
   0xc   :  { %5108 = sst [smem:[#allocation47_spill]] %s5057_s11 }
   0xd   :  { %5109 = sst [smem:[#allocation48_spill]] %s5058_s12 }
   0xe   :  { %5110 = sst [smem:[#allocation49_spill]] %s5059_s13 }
   0xf   :  { %5111 = sst [smem:[#allocation50_spill]] %s5060_s14 }
  0x10   :  { %5112 = sst [smem:[#allocation51_spill]] %s5061_s15 }
  0x11   :  { %5113 = sst [smem:[#allocation52_spill]] %s5062_s16 }
  0x12   :  { %21 = vsyncpa [#allocation5], 0 }
  0x13   :  { %23 = vsyncpa [#allocation5 + $0x1], 0 }
  0x14   :  { %24 = vsyncpa [#allocation8], 0 }
  0x15   :  { %26 = vsyncpa [#allocation8 + $0x1], 0 }
  0x16   :  { %27 = vsyncpa [#allocation11], 0 }
  0x17   :  { %29 = vsyncpa [#allocation11 + $0x1], 0 }
  0x18   :  { %30 = vsyncpa [#allocation6], 0 }
  0x19   :  { %32 = vsyncpa [#allocation6 + $0x1], 0  ;;  %s4291_s21 = smov 0   ;;  %s4293_s22 = smov 0  }
  0x1a   :  { %s4295_s23 = smov 0   ;;  %s4297_s24 = smov 0  }
  0x1b   :  { %s4299_s25 = smov 0   ;;  %s4301_s26 = smov 0  }
  0x1c   :  { %s4303_s27 = smov 0   ;;  %s4305_s28 = smov 0  }
  0x1d   :  { %s4307_s29 = smov 0   ;;  %s4309_s30 = smov 0  }
  0x1e   :  { %s4311_s0 = smov 0  }
  0x1f LB: > { %5114 = sst [smem:[#allocation19_spill]] %s4152_s22  ;;  %s4347_s17 = sadd.s32 4294967295, %s4188_s0   ;;  %s4188_s0 = sphi %s4311_s0, %s38_s0   ;;  %s4184_s30 = sphi %s4309_s30, %s5205_s30   ;;  %s4180_s29 = sphi %s4307_s29, %s5204_s29   ;;  %s4176_s28 = sphi %s4305_s28, %s5203_s28   ;;  %s4172_s27 = sphi %s4303_s27, %s5202_s27   ;;  %s4168_s26 = sphi %s4301_s26, %s5201_s26   ;;  %s4164_s25 = sphi %s4299_s25, %s5200_s25   ;;  %s4160_s24 = sphi %s4297_s24, %s5199_s24   ;;  %s4156_s23 = sphi %s4295_s23, %s5198_s23   ;;  %s4152_s22 = sphi %s4293_s22, %s5197_s22   ;;  %s4148_s21 = sphi %s4291_s21, %s5196_s21  }
  0x20   : > { %5115 = sst [smem:[#allocation20_spill]] %s4156_s23  ;;  %s3582_s18 = sadd.s32 4294967294, %s4188_s0  }
  0x21   : > { %5116 = sst [smem:[#allocation21_spill]] %s4160_s24  ;;  %s47_s19 = sadd.s32 1, %s4180_s29 }
  0x22   : > { %5117 = sst [smem:[#allocation22_spill]] %s4164_s25  ;;  %s50_s20 = sadd.s32 1, %s4184_s30 }
  0x23   : > { %5118 = sst [smem:[#allocation23_spill]] %s4168_s26  ;;  %p48_p0 = scmp.ge.s32.totalorder %s47_s19, 2 }
  0x24   : > { %5119 = sst [smem:[#allocation24_spill]] %s4172_s27  ;;  %s57_s16 = sadd.s32 1, %s4168_s26 }
  0x25   : > { %5120 = sst [smem:[#allocation25_spill]] %s4176_s28  ;;  %p64_p1 = scmp.ne.s32.totalorder %s4168_s26, %s4164_s25 }
  0x26   : > { %5121 = sst [smem:[#allocation26_spill]] %s4180_s29  ;;  %p65_p2 = scmp.eq.s32.totalorder %s4188_s0, 0 }
  0x27   : > { %5122 = sst [smem:[#allocation27_spill]] %s4184_s30  ;;  %s5207_s19 = smov (%p48_p0, %s47_s19), 0 }
  0x28   : > { %5123 = sst [smem:[#allocation28_spill]] %s4188_s0  ;;  %s5209_s20 = smov (!%p48_p0, %s50_s20), %s4184_s30 }
  0x29   : > { %5124 = sst [smem:[#allocation29_spill]] %s5207_s19  ;;  %p4364_p3 = por %p65_p2, %p64_p1 }
  0x2a   : > { %p5066_p4 = scmp.ne.s32.totalorder %s4164_s25, %s4160_s24  ;;  %p52_p5 = scmp.ge.s32.totalorder %s5209_s20, 2 }
  0x2b   : > { %p71_p6 = scmp.eq.s32.totalorder %s4347_s17, 0  ;;  %s236_s15 = ssub.s32 %s4180_s29, %s5207_s19 }
  0x2c   : > { %s239_s14 = sadd.s32 1, %s4156_s23  ;;  %s5211_s20 = smov (%p52_p5, %s5209_s20), 0 }
  0x2d   : > { %5126 = sst [smem:[#allocation30_spill]] %s5211_s20  ;;  %p4381_p7 = por %p71_p6, %p5066_p4 }
  0x2e   : > { %p237_p8 = scmp.eq.s32.totalorder %s236_s15, 0  ;;  %s54_s12 = ssub.s32 %s4184_s30, %s5211_s20 }
  0x2f   : > { %s5127_s13 = scalar_select %p4381_p7, 1, 0 }
  0x30   : > { %p246_p9 = scmp.ne.s32.totalorder %s4156_s23, %s4152_s22  ;;  %p55_p10 = scmp.eq.s32.totalorder %s54_s12, 0 }
  0x31   : > { %p252_p11 = scmp.ne.s32.totalorder %s4152_s22, %s4148_s21  ;;  %p484_p0 = scmp.eq.s32.totalorder %s4347_s17, 3 }
  0x32   : > { %s4392_s19 = scalar_select %p237_p8, %s4156_s23, %s239_s14  }
  0x33   : > { %s4395_s10 = scalar_select %p55_p10, %s4168_s26, %s57_s16  }
  0x34   : > { %5128 = sst [smem:[#allocation31_spill]] %s4392_s19  ;;  %p4399_p12 = por %p246_p9, %p65_p2 }
  0x35   : > { %5129 = sst [smem:[#allocation32_spill]] %s4395_s10  ;;  %p4405_p13 = por %p252_p11, %p71_p6 }
  0x36   : > { %p490_p5 = scmp.eq.s32.totalorder %s3582_s18, 3  ;;  %p3779_p4 = scmp.lt.s32.totalorder %s4188_s0, 4 }
  0x37   : > { %s5131_s15 = scalar_select %p4405_p13, 1, 0 }
  0x38   : > { %p4414_p8 = por %p484_p0, %p64_p1  ;;  %p5135_p10 = scmp.ne.s32.totalorder %s4164_s25, %s4160_s24 }
  0x39   : > { %5132 = sst [smem:[#allocation33_spill]] %s5131_s15  ;;  %s5071_s16 = sand.u32 1, %s4168_s26  }
  0x3a   : > { %s5133_s12 = scalar_select %p4414_p8, 1, 0 }
  0x3b   : > { %p4421_p2 = por %p490_p5, %p5135_p10  ;;  %s5073_s21 = sshll.u32 %s4184_s30, 7 }
  0x3c   : > { %5134 = sst [smem:[#allocation34_spill]] %s5133_s12  ;;  %s4429_s20 = sshll.u32 %s5071_s16, 3 }
  0x3d   : > { %s5136_s14 = scalar_select %p4421_p2, 1, 0 }
  0x3e   : > { %p4433_p6 = pnand %p3779_p4, %p4364_p3  ;;  %s5075_s10 = sand.u32 1, %s4188_s0  }
  0x3f   : > { %5137 = sst [smem:[#allocation35_spill]] %s5136_s14  ;;  %s532_s16 = scalar_lea.vmem [#allocation7], %s4429_s20 }
  0x40   : > { %s5138_s18 = scalar_select %p4433_p6, 1, 0 }
  0x41   : > { %s5139_s1 = sld [smem:[#allocation37_spill]]  ;;  %s539_s28 = sshll.u32 %s532_s16, 4  ;;  %s4446_s28 = int_to_ptr.vmem [resolvable:$true] %s539_s28 }
  0x42   : > { %p4450_p1 = pnand %p3779_p4, %p4399_p12  ;;  %s4456_s6 = scalar_lea.sflag [#allocation8], %s5075_s10 }
  0x43   : > { %p5079_p9 = pneg %p4433_p6 }
  0x44   : > { %s5140_s14 = scalar_select %p4450_p1, 1, 0 }
  0x47   : > { %s4443_s12 = scalar_lea.hbm %s5139_s1, %s5073_s21  ;;  %s3909_s16 = scalar_lea.hbm %s5139_s1, 256 }
  0x48   : > { %s3904_s5 = scalar_lea.hbm %s4443_s12, 128  ;;  %p3910_p4 = scmp.lt.u32.totalorder %s4443_s12, %s5139_s1 }
  0x49   : > { %p3905_p3 = scmp.ne.s32.totalorder %s4443_s12, %s3904_s5  ;;  %p3911_p12 = scmp.lt.u32.totalorder %s3909_s16, %s3904_s5 }
  0x4a   : > { %p3913_p10 = scmp.lt.u32.totalorder %s3904_s5, %s4443_s12 }
  0x4b   : > { %p3907_p11 = pnand %p5079_p9, %p3905_p3  ;;  %p3912_p5 = por %p3911_p12, %p3910_p4 }
  0x4d   : > { %p3908_p0 = pneg %p3907_p11  ;;  %p3914_p2 = por %p3913_p10, %p3912_p5 }
  0x4f   : > { %p3915_p8 = pnand %p3914_p2, %p3908_p0 }
  0x51   : > { %3918 = shalt.err (!%p3915_p8)
}
  0x52   : > { %s3919_s10 = scalar_lea.vmem %s4446_s28, 128  ;;  %s4190_s24 = smov [#allocation7]  }
  0x53   : > { %p3920_p3 = scmp.ne.s32.totalorder %s4446_s28, %s3919_s10  ;;  %s3924_s19 = sshll.u32 %s4190_s24, 4  ;;  %s3925_s19 = int_to_ptr.vmem [resolvable:$false] %s3924_s19 }
  0x54   : > { %s3926_s21 = scalar_lea.vmem %s3925_s19, 256  ;;  %p3927_p7 = scmp.lt.s32.totalorder %s4446_s28, %s3925_s19 }
  0x55   : > { %p3922_p11 = pnand %p3920_p3, %p5079_p9  ;;  %p3928_p4 = scmp.lt.s32.totalorder %s3926_s21, %s3919_s10 }
  0x57   : > { %p3923_p13 = pneg %p3922_p11  ;;  %p3929_p12 = por %p3928_p4, %p3927_p7 }
  0x59   : > { %p3930_p5 = pnand %p3929_p12, %p3923_p13 }
  0x5b   : > { %3933 = shalt.err (!%p3930_p5)
}
  0x5c   : > { %3765 = dma.hbm_to_vmem [thread:$0]  (!%p4433_p6), %s4443_s12, 128, %s4446_s28, %s4456_s6  }
  0x5d   : > { %p3594_p8 = scmp.ge.s32.totalorder %s4188_s0, 1  ;;  %p673_p2 = scmp.lt.s32.totalorder %s4188_s0, 5 }
  0x5e   : > { %s4487_s5 = sand.u32 1, %s4156_s23   ;;  %s3649_s10 = sshll.u32 %s4180_s29, 8 }
  0x5f   : > { %p4490_p7 = pnand %p3594_p8, %p673_p2  ;;  %s3590_s11 = sshll.u32 %s4487_s5, 4 }
  0x60   : > { %s5142_s8 = sld [smem:[#allocation44_spill]]  ;;  %s603_s12 = scalar_lea.vmem [#allocation10], %s3590_s11 }
  0x61   : > { %s5141_s16 = scalar_select %p4490_p7, 1, 0 }
  0x62   : > { %s610_s28 = sshll.u32 %s603_s12, 4  ;;  %s5143_s1 = sand.u32 1, %s4188_s0   ;;  %s4500_s28 = int_to_ptr.vmem [resolvable:$true] %s610_s28 }
  0x63   : > { %s4504_s23 = scalar_lea.sflag [#allocation11], %s5143_s1  ;;  %p4510_p0 = pneg %p4450_p1 }
  0x65   : > { %s5144_s2 = scalar_select %p4510_p0, 1, 0 }
  0x66   : > { %s4498_s21 = scalar_lea.hbm %s5142_s8, %s3649_s10  ;;  %s3939_s11 = scalar_lea.hbm %s5142_s8, 512 }
  0x67   : > { %s3934_s4 = scalar_lea.hbm %s4498_s21, 256  ;;  %p3940_p11 = scmp.lt.u32.totalorder %s4498_s21, %s5142_s8 }
  0x68   : > { %p3935_p13 = scmp.ne.s32.totalorder %s4498_s21, %s3934_s4  ;;  %p3941_p4 = scmp.lt.u32.totalorder %s3939_s11, %s3934_s4 }
  0x69   : > { %p3943_p5 = scmp.lt.u32.totalorder %s3934_s4, %s4498_s21 }
  0x6a   : > { %p3937_p10 = pnand %p4510_p0, %p3935_p13  ;;  %p3942_p12 = por %p3941_p4, %p3940_p11 }
  0x6c   : > { %p3938_p3 = pneg %p3937_p10  ;;  %p3944_p8 = por %p3943_p5, %p3942_p12 }
  0x6e   : > { %p3945_p2 = pnand %p3944_p8, %p3938_p3 }
  0x70   : > { %3948 = shalt.err (!%p3945_p2)
}
  0x71   : > { %s3949_s1 = scalar_lea.vmem %s4500_s28, 256  ;;  %s4191_s10 = smov [#allocation10]  }
  0x72   : > { %p3950_p13 = scmp.ne.s32.totalorder %s4500_s28, %s3949_s1  ;;  %s3954_s24 = sshll.u32 %s4191_s10, 4  ;;  %s3955_s24 = int_to_ptr.vmem [resolvable:$false] %s3954_s24 }
  0x73   : > { %s3956_s19 = scalar_lea.vmem %s3955_s24, 512  ;;  %p3957_p7 = scmp.lt.s32.totalorder %s4500_s28, %s3955_s24 }
  0x74   : > { %p3952_p10 = pnand %p3950_p13, %p4510_p0  ;;  %p3958_p6 = scmp.lt.s32.totalorder %s3956_s19, %s3949_s1 }
  0x76   : > { %p3953_p9 = pneg %p3952_p10  ;;  %p3959_p11 = por %p3958_p6, %p3957_p7 }
  0x78   : > { %p3960_p4 = pnand %p3959_p11, %p3953_p9 }
  0x7a   : > { %3963 = shalt.err (!%p3960_p4)
}
  0x7b   : > { %s4192_s4 = smov 64   ;;  %s4193_s11 = smov 4  }
  0x7c   : > { %3771 = dma.hbm_to_vmem [thread:$0]  (!%p4450_p1), %s4498_s21, 256, %s4500_s28, %s4504_s23, %s4192_s4, %s4192_s4, %s4193_s11  }
  0x7d   : > { %s5145_s12 = sshll.u32 %s4184_s30, 7  ;;  %s5146_s24 = sld [smem:[#allocation36_spill]] }
  0x7e   : > { %s514_s19 = scalar_lea.vmem [#allocation4], %s4429_s20  ;;  %s5148_s27 = sand.u32 1, %s4168_s26  }
  0x7f   : > { %s521_s0 = sshll.u32 %s514_s19, 4  ;;  %s511_s15 = scalar_lea.sflag [#allocation5], %s5148_s27  ;;  %s522_s0 = int_to_ptr.vmem [resolvable:$true] %s521_s0 }
  0x80   : > { %p5149_p9 = scmp.ne.s32.totalorder %s5138_s18, 0 }
  0x82   : > { %p5150_p7 = pneg %p5149_p9 }
  0x83   : > { %s5147_s3 = smov %s5146_s24  ;;  %s4539_s1 = scalar_lea.hbm %s5146_s24, %s5145_s12 }
  0x84   : > { %s3964_s22 = scalar_lea.hbm %s4539_s1, 128  ;;  %s3969_s8 = scalar_lea.hbm %s5147_s3, 256 }
  0x85   : > { %p3965_p6 = scmp.ne.s32.totalorder %s4539_s1, %s3964_s22  ;;  %p3970_p5 = scmp.lt.u32.totalorder %s4539_s1, %s5147_s3 }
  0x86   : > { %p3971_p8 = scmp.lt.u32.totalorder %s3969_s8, %s3964_s22  ;;  %p3973_p13 = scmp.lt.u32.totalorder %s3964_s22, %s4539_s1 }
  0x87   : > { %p3967_p3 = pnand %p3965_p6, %p5150_p7 }
  0x88   : > { %p3972_p2 = por %p3971_p8, %p3970_p5 }
  0x89   : > { %p3968_p12 = pneg %p3967_p3 }
  0x8a   : > { %p3974_p10 = por %p3973_p13, %p3972_p2 }
  0x8c   : > { %p3975_p11 = pnand %p3974_p10, %p3968_p12 }
  0x8e   : > { %3978 = shalt.err (!%p3975_p11)
}
  0x8f   : > { %s3979_s27 = scalar_lea.vmem %s522_s0, 128  ;;  %p5151_p6 = pmov %p5150_p7 }
  0x90   : > { %p3980_p4 = scmp.ne.s32.totalorder %s522_s0, %s3979_s27  ;;  %s4194_s20 = smov [#allocation4]  }
  0x91   : > { %s3984_s12 = sshll.u32 %s4194_s20, 4  ;;  %s3985_s12 = int_to_ptr.vmem [resolvable:$false] %s3984_s12 }
  0x92   : > { %p3982_p7 = pnand %p3980_p4, %p5151_p6  ;;  %s3986_s10 = scalar_lea.vmem %s3985_s12, 256 }
  0x93   : > { %p3987_p1 = scmp.lt.s32.totalorder %s522_s0, %s3985_s12  ;;  %p3988_p0 = scmp.lt.s32.totalorder %s3986_s10, %s3979_s27 }
  0x94   : > { %p3983_p3 = pneg %p3982_p7 }
  0x95   : > { %p3989_p5 = por %p3988_p0, %p3987_p1 }
  0x97   : > { %p3990_p8 = pnand %p3989_p5, %p3983_p3 }
  0x99   : > { %3993 = shalt.err (!%p3990_p8)
}
  0x9a   : > { %3762 = dma.hbm_to_vmem [thread:$0]  (!%p5149_p9), %s4539_s1, 128, %s522_s0, %s511_s15  }
  0x9b   : > { %s3589_s22 = sshll.u32 %s4180_s29, 4  ;;  %s585_s24 = scalar_lea.vmem [#allocation9], %s4487_s5 }
  0x9c   : > { %s592_s19 = sshll.u32 %s585_s24, 4  ;;  %s5152_s7 = sld [smem:[#allocation43_spill]]  ;;  %s593_s19 = int_to_ptr.vmem [resolvable:$true] %s592_s19 }
  0x9d   : > { %p5153_p0 = scmp.ne.s32.totalorder %s5144_s2, 0 }
  0xa2   : > { %s590_s8 = scalar_lea.hbm %s5152_s7, %s3589_s22  ;;  %s3999_s27 = scalar_lea.hbm %s5152_s7, 32 }
  0xa3   : > { %s3994_s4 = scalar_lea.hbm %s590_s8, 16  ;;  %p4000_p9 = scmp.lt.u32.totalorder %s590_s8, %s5152_s7 }
  0xa4   : > { %p3995_p1 = scmp.ne.s32.totalorder %s590_s8, %s3994_s4  ;;  %p4001_p13 = scmp.lt.u32.totalorder %s3999_s27, %s3994_s4 }
  0xa5   : > { %p4003_p11 = scmp.lt.u32.totalorder %s3994_s4, %s590_s8 }
  0xa6   : > { %p3997_p12 = pnand %p3995_p1, %p5153_p0  ;;  %p4002_p10 = por %p4001_p13, %p4000_p9 }
  0xa8   : > { %p3998_p2 = pneg %p3997_p12  ;;  %p4004_p4 = por %p4003_p11, %p4002_p10 }
  0xaa   : > { %p4005_p6 = pnand %p4004_p4, %p3998_p2 }
  0xac   : > { %4008 = shalt.err (!%p4005_p6)
}
  0xad   : > { %s4009_s15 = scalar_lea.vmem %s593_s19, 16  ;;  %s4195_s1 = smov [#allocation9]  }
  0xae   : > { %p4010_p7 = scmp.ne.s32.totalorder %s593_s19, %s4009_s15  ;;  %s4014_s12 = sshll.u32 %s4195_s1, 4  ;;  %s4015_s12 = int_to_ptr.vmem [resolvable:$false] %s4014_s12 }
  0xaf   : > { %s4016_s10 = scalar_lea.vmem %s4015_s12, 32  ;;  %p4017_p8 = scmp.lt.s32.totalorder %s593_s19, %s4015_s12 }
  0xb0   : > { %p4012_p3 = pnand %p4010_p7, %p5153_p0  ;;  %p4018_p1 = scmp.lt.s32.totalorder %s4016_s10, %s4009_s15 }
  0xb2   : > { %p4013_p5 = pneg %p4012_p3  ;;  %p4019_p12 = por %p4018_p1, %p4017_p8 }
  0xb4   : > { %p4020_p9 = pnand %p4019_p12, %p4013_p5 }
  0xb6   : > { %4023 = shalt.err (!%p4020_p9)
}
  0xb7   : > { %p5154_p13 = scmp.ne.s32.totalorder %s5140_s14, 0  ;;  %s5155_s9 = sld [smem:[#allocation45_spill]] }
  0xb8   : > { %s623_s4 = scalar_lea.vmem [#allocation12], %s4487_s5 }
  0xb9   : > { %3768 = dma.hbm_to_vmem [thread:$0]  (!%p5154_p13), %s590_s8, 16, %s593_s19, %s4456_s6  }
  0xba   : > { %s630_s18 = sshll.u32 %s623_s4, 4  ;;  %s631_s18 = int_to_ptr.vmem [resolvable:$true] %s630_s18 }
  0xbd   : > { %s4588_s28 = scalar_lea.hbm %s5155_s9, %s3589_s22  ;;  %s4029_s19 = scalar_lea.hbm %s5155_s9, 32 }
  0xbe   : > { %s4024_s11 = scalar_lea.hbm %s4588_s28, 16  ;;  %p4030_p4 = scmp.lt.u32.totalorder %s4588_s28, %s5155_s9 }
  0xbf   : > { %p4025_p2 = scmp.ne.s32.totalorder %s4588_s28, %s4024_s11  ;;  %p4031_p6 = scmp.lt.u32.totalorder %s4029_s19, %s4024_s11 }
  0xc0   : > { %p4033_p3 = scmp.lt.u32.totalorder %s4024_s11, %s4588_s28 }
  0xc1   : > { %p4027_p10 = pnand %p4025_p2, %p5153_p0  ;;  %p4032_p7 = por %p4031_p6, %p4030_p4 }
  0xc3   : > { %p4028_p11 = pneg %p4027_p10  ;;  %p4034_p5 = por %p4033_p3, %p4032_p7 }
  0xc5   : > { %p4035_p8 = pnand %p4034_p5, %p4028_p11 }
  0xc7   : > { %4038 = shalt.err (!%p4035_p8)
}
  0xc8   : > { %s4039_s5 = scalar_lea.vmem %s631_s18, 16  ;;  %s4196_s22 = smov [#allocation12]  }
  0xc9   : > { %p4040_p1 = scmp.ne.s32.totalorder %s631_s18, %s4039_s5  ;;  %s4044_s0 = sshll.u32 %s4196_s22, 4  ;;  %s4045_s0 = int_to_ptr.vmem [resolvable:$false] %s4044_s0 }
  0xca   : > { %s4046_s15 = scalar_lea.vmem %s4045_s0, 32  ;;  %p4047_p2 = scmp.lt.s32.totalorder %s631_s18, %s4045_s0 }
  0xcb   : > { %p4042_p12 = pnand %p4040_p1, %p5153_p0  ;;  %p4048_p10 = scmp.lt.s32.totalorder %s4046_s15, %s4039_s5 }
  0xcd   : > { %p4043_p9 = pneg %p4042_p12  ;;  %p4049_p13 = por %p4048_p10, %p4047_p2 }
  0xcf   : > { %p4050_p4 = pnand %p4049_p13, %p4043_p9 }
  0xd1   : > { %4053 = shalt.err (!%p4050_p4)
}
  0xd2   : > { %p5156_p6 = scmp.ne.s32.totalorder %s5140_s14, 0  ;;  %p5157_p11 = scmp.ne.s32.totalorder %s5141_s16, 0 }
  0xd3   : > { %s4612_s2 = sand.u32 (!%p5157_p11), 1, %s4164_s25   ;;  %p5158_p0 = scmp.ne.s32.totalorder (!%p5157_p11), %s5127_s13, 0 }
  0xd4   : > { %3774 = dma.hbm_to_vmem [thread:$0]  (!%p5156_p6), %s4588_s28, 16, %s631_s18, %s4504_s23  }
  0xd5   : > { %677 = sbr.rel (%p5157_p11) target bundleno = 3352 (0xd18), region = 84  ;;  %s4615_s1 = sshll.u32 (!%p5157_p11), %s4612_s2, 3 }
  0xd6   : > { %s680_s12 = scalar_lea.sflag (!%p5157_p11), [#allocation5], %s4612_s2 }
  0xdc   : > { %4127 = dma.done.wait (%p5158_p0), %s680_s12, 128  }
  0xdd   : > { %4129 = vsyncadd (%p5158_p0), %s680_s12, 4294967168  ;;  %s688_s23 = sand.u32 1, %s4347_s17  }
  0xde   : > { %s689_s14 = scalar_lea.sflag [#allocation8], %s688_s23 }
  0xdf   : > { %4131 = dma.done.wait (%p5158_p0), %s689_s14, 128  }
  0xe0   : > { %4133 = vsyncadd (%p5158_p0), %s689_s14, 4294967168  ;;  %s5159_s24 = sld [smem:[#allocation19_spill]]  ;;  %s5160_s21 = sld [smem:[#allocation33_spill]] }
  0xe6   : > { %s4630_s28 = sand.u32 1, %s5159_s24   ;;  %p5161_p13 = scmp.ne.s32.totalorder %s5160_s21, 0 }
  0xe8   : > { %4135 = dma.done.wait (%p5161_p13), %s689_s14, 16  }
  0xe9   : > { %4137 = vsyncadd (%p5161_p13), %s689_s14, 4294967280  ;;  %s3597_s17 = sshll.u32 %s4630_s28, 4  ;;  %s706_s18 = scalar_lea.sflag [#allocation11], %s688_s23 }
  0xea   : > { %s4638_s11 = scalar_lea.vmem [#allocation10], %s3597_s17 }
  0xeb   : > { %4139 = dma.done.wait (%p5161_p13), %s706_s18, 272  }
  0xec   : > { %4141 = vsyncadd (%p5161_p13), %s706_s18, 4294967024  ;;  %s5162_s13 = sld [smem:[#allocation24_spill]]  ;;  %s5164_s15 = sld [smem:[#allocation38_spill]] }
  0xed   : > { %s5165_s24 = sld [smem:[#allocation40_spill]]  ;;  %s5167_s7 = sld [smem:[#allocation42_spill]] }
  0xee   : > { %s5169_s30 = sld [smem:[#allocation46_spill]]  ;;  %s5170_s29 = sld [smem:[#allocation48_spill]] }
  0xef   : > { %s5171_s16 = sld [smem:[#allocation49_spill]]  ;;  %s5173_s5 = sld [smem:[#allocation51_spill]] }
  0xf0   : > { %s717_s22 = scalar_lea.vmem [#allocation12], %s4630_s28  ;;  %s824_s0 = scalar_lea.vmem [#allocation13], %s4615_s1 }
  0xf2   : > { %p825_p7 = scmp.lt.s32.totalorder %s5162_s13, 1  ;;  %p3607_p3 = scmp.ne.s32.totalorder %s5162_s13, 0 }
  0xf3   : > { %vm872_vm0 = vcmask (!%p3607_p3), 261120  }
  0xf4   : > { %s4646_s27 = scalar_select %p825_p7, %s5162_s13, 1 }
  0xf6   : > { %s3650_s6 = sshll.u32 %s4646_s27, 4  ;;  %s3653_s19 = sshll.u32 %s4646_s27, 5 }
  0xf7   : > { %s829_s12 = scalar_lea.vmem %s5164_s15, %s3650_s6  ;;  %s4659_s21 = scalar_lea.vmem %s5165_s24, %s3650_s6 }
  0xf8   : > { %s4668_s9 = scalar_lea.vmem %s5167_s7, %s3650_s6  ;;  %s4678_s23 = scalar_lea.vmem %s5169_s30, %s3653_s19 }
  0xf9   : > { %s856_s17 = scalar_lea.vmem %s5170_s29, %s4646_s27  ;;  %s859_s3 = scalar_lea.vmem %s5171_s16, %s4646_s27 }
  0xfa   : > { %s5172_s6 = sld [smem:[#allocation50_spill]]  ;;  %s865_s20 = scalar_lea.vmem %s5173_s5, %s4646_s27 }
  0xfb   : > { %870 = sbr.rel (%p3607_p3) target bundleno = 258 (0x102), region = 108  ;;  %s5174_s30 = scalar_lea.vmem (!%p3607_p3), [#allocation4], %s4615_s1 }
  0xfc   : > { %v871_v0 = vld [vmem:[%s5174_s30] sm:$0xff] (!%p3607_p3)  ;;  %s5175_s29 = scalar_lea.vmem (!%p3607_p3), [#allocation7], %s4615_s1 }
  0xfd   : > { %v874_v1 = vld [vmem:[%s5175_s29] sm:$0xff] (!%p3607_p3)  ;;  %873 = vst.msk [vmem:[#allocation2] sm:$0xff] (!%p3607_p3), %vm872_vm0, %v871_v0 }
  0xfe   : > { %875 = vst.msk [vmem:[#allocation3] sm:$0xff] (!%p3607_p3), %vm872_vm0, %v874_v1 }
 0x100   : > { %s862_s26 = scalar_lea.vmem %s5172_s6, %s4646_s27 }
 0x102 PF: > { %v3879_v2 = vld [vmem:[%s829_s12] sm:$0xff]   ;;  %v4197_v3 = vmov 0.0   ;;  %v3880_v4 = vld [vmem:[%s829_s12 + $0x8] sm:$0xff]   ;;  %vm4198_vm1 = vmmov 0   ;;  %vm904_vm2 = vcmask 261120   ;;  %s5176_s13 = sld [smem:[#allocation39_spill]]  ;;  %v1022_v17 = vlaneseq }
 0x103   : > { %3679 = vmatprep.subr.bf16.mxu1 %v4197_v3  ;;  %3695 = vmatprep.subr.bf16.mxu0 %v4197_v3  ;;  %s4199_s19 = smov 112   ;;  %s4200_s15 = smov 96   ;;  %v4201_v15 = vmov 1983009808   ;;  %v3881_v18 = vld [vmem:[%s4659_s21] sm:$0xff]   ;;  %v3882_v23 = vld [vmem:[%s4659_s21 + $0x8] sm:$0xff]  }
 0x104   : > { %3680 = vmatpush3.bf16.msra.mxu1 %v3879_v2  ;;  %3683 = vmatprep.mubr.msk.bf16.mxu1 %vm4198_vm1, %v4197_v3  ;;  %v876_v5 = vld [vmem:[#allocation2] sm:$0xff]  ;;  %v1020_v16 = vunpack.c.l.s4 %v4201_v15  ;;  %v4202_v19 = vmov 1934713408   ;;  %v1023_v22 = vshrl.u32 %v1022_v17, 7  ;;  %s5178_s24 = sld [smem:[#allocation41_spill]]  ;;  %vm1962_vm3 = vcmask 130048  }
 0x105   : > { %v877_v6 = vld [vmem:[#allocation3] sm:$0xff]  ;;  %3681 = vmatprep.subr.bf16.mxu1 %v4197_v3  ;;  %3697 = vmatprep.mubr.msk.bf16.mxu0 %vm4198_vm1, %v4197_v3  ;;  %v1051_v20 = vunpack.c.l.s4 %v4202_v19  ;;  %v880_v26 = vpack.c.bf16 %v876_v5, %v876_v5  ;;  %vm2049_vm4 = vcmask 64512   ;;  %s5180_s18 = scalar_lea.vmem [#allocation9], %s4630_s28  ;;  %vm3215_vm5 = vcmask 523264   ;;  %s5183_s30 = sld [smem:[#allocation47_spill]] }
 0x106   : > { %v878_v7 = vadd.f32 %v877_v6, %v876_v5  ;;  %v1021_v21 = vunpack.c.0.s8 %v1020_v16 }
 0x107   : > { %v1052_v24 = vunpack.c.0.s8 %v1051_v20 }
 0x108   : > { %v879_v8 = vpack.c.bf16 %v878_v7, %v878_v7  ;;  %3682 = vmatpush3.bf16.msra.mxu1 %v3880_v4  ;;  %s5177_s12 = scalar_lea.vmem %s5176_s13, %s4646_s27  ;;  %v4723_v25 = vsub.s32 %v1021_v21, %v1023_v22 }
 0x109   : > { %3687 = vmatprep.subr.bf16.mxu1 %v4197_v3  ;;  %v3608_v9 = vld [vmem:[%s5177_s12] ss:$0 sm:$0xff]  ;;  %v4727_v28 = vsub.s32 %v1052_v24, %v1023_v22  ;;  %s5187_s12 = sld [smem:[#allocation24_spill]] }
 0x10a   : > { %s5179_s4 = scalar_lea.vmem %s5178_s24, %s4646_s27 }
 0x10b   : > { %3684 = vmatmul.mubr.msk.bf16.vlgmr.msra.gmra.mrb[0].mxu1 %vm904_vm2, %v879_v8  ;;  %s5184_s29 = scalar_lea.vmem %s5183_s30, %s4646_s27 }
 0x10c   : > { %3691 = vmatprep.mubr.msk.bf16.mxu1 %vm4198_vm1, %v4197_v3  ;;  %3688 = vmatpush3.bf16.msra.mxu1 %v3881_v18 }
 0x10d   : > { %3689 = vmatprep.subr.bf16.mxu1 %v4197_v3 }
 0x10f   : > { %p3644_p5 = scmp.ne.s32.totalorder %s5187_s12, 1 }
 0x110   : > { %3690 = vmatpush3.bf16.msra.mxu1 %v3882_v23 }
 0x111   : > { %3701 = vmatprep.subr.bf16.mxu1 %v4197_v3 }
 0x113   : > { %3692 = vmatmul.mubr.msk.bf16.vlgmr.msra.gmra.mrb[4].mxu1 %vm904_vm2, %v880_v26 }
 0x114   : > { %3703 = vmatprep.mubr.msk.bf16.mxu1 %vm4198_vm1, %v4197_v3 }
 0x1de   : > { %v942_v10 = vpop.f32.mrb[0].mxu1 }
 0x1df   : > { %v943_v11 = vadd.f32 %v3608_v9, %v942_v10  ;;  %v3685_v12 = vpop.f32.mrb[1].mxu1 }
 0x1e0   : > { %v945_v13 = vpop.f32.mrb[2].mxu1 }
 0x1e1   : > { %1015 = vrot.lane.b32.xlu0 %v943_v11, %s4199_s19  ;;  %v3686_v14 = vpop.f32.mrb[3].mxu1  ;;  %v1018_v27 = vcombine.high %v943_v11, %v4197_v3  ;;  %v1025_v30 = vrot.slane %v943_v11, %v4723_v25 }
 0x1e3   : > { %v1032_v33 = vrot.slane %v1018_v27, %v4723_v25 }
 0x1e5   : > { %1092 = vrot.lane.b32.xlu0 %v943_v11, %s4200_s15 }
 0x253   : > { %v1016_v29 = vpop.permute.xlu0 %1015 }
 0x254   : > { %v1033_v31 = vcombine.high %v1016_v29, %v4197_v3  ;;  %v1040_v32 = vrot.slane %v1016_v29, %v4723_v25  ;;  %1094 = vrot.lane.b32.xlu1 %v1016_v29, %s4200_s15 }
 0x256   : > { %v1047_v34 = vrot.slane %v1033_v31, %v4723_v25  ;;  %v1048_v35 = vcombine.low %v1025_v30, %v1040_v32  ;;  %v1049_v36 = vcombine.high %v1025_v30, %v1040_v32  ;;  %v4775_v30 = vpop.f32.mrb[4].mxu1 }
 0x257   : > { %v1093_v63 = vpop.permute.xlu0 %1092  ;;  %v3693_v31 = vpop.f32.mrb[5].mxu1 }
 0x258   : > { %v1056_v37 = vrot.slane %v1048_v35, %v4727_v28  ;;  %v1063_v38 = vrot.slane %v1049_v36, %v4727_v28  ;;  %v1064_v39 = vcombine.low %v1032_v33, %v1047_v34  ;;  %v1065_v40 = vcombine.high %v1032_v33, %v1047_v34  ;;  %v1011_v32 = vpop.f32.mrb[6].mxu1 }
 0x259   : > { %v1098_v0 = vcombine.high %v1093_v63, %v4197_v3  ;;  %v1105_v2 = vrot.slane %v1093_v63, %v4723_v25  ;;  %v3694_v33 = vpop.f32.mrb[7].mxu1 }
 0x25a   : > { %v1072_v41 = vrot.slane %v1064_v39, %v4727_v28  ;;  %v1079_v42 = vrot.slane %v1065_v40, %v4727_v28  ;;  %v1080_v43 = vcombine.high %v1056_v37, %v4197_v3  ;;  %v1081_v44 = vcombine.high %v1063_v38, %v4197_v3 }
 0x25b   : > { %v1112_v6 = vrot.slane %v1098_v0, %v4723_v25 }
 0x25c   : > { %v1082_v45 = vcombine.high %v1072_v41, %v4197_v3  ;;  %v1083_v46 = vcombine.high %v1079_v42, %v4197_v3  ;;  %v3616_v47 = vpack.c.bf16 %v1072_v41, %v1056_v37  ;;  %v3617_v48 = vpack.c.bf16 %v1079_v42, %v1063_v38 }
 0x25e   : > { %v1257_v49 = vrot.slane %v3616_v47, %v4723_v25  ;;  %v1265_v50 = vrot.slane %v3617_v48, %v4723_v25  ;;  %v3618_v51 = vpack.c.bf16 %v1082_v45, %v1080_v43  ;;  %v3619_v52 = vpack.c.bf16 %v1083_v46, %v1081_v44 }
 0x260   : > { %v1266_v53 = vcombine.low %v1257_v49, %v1265_v50  ;;  %v1281_v54 = vrot.slane %v3618_v51, %v4723_v25  ;;  %v1289_v55 = vrot.slane %v3619_v52, %v4723_v25 }
 0x262   : > { %v4750_v56 = vrot.slane %v1266_v53, %v4727_v28  ;;  %v1290_v57 = vcombine.low %v1281_v54, %v1289_v55 }
 0x264   : > { %v4753_v58 = vrot.slane %v1290_v57, %v4727_v28  ;;  %v1301_v60 = vshrl.u32 %v4750_v56, 16 }
 0x266   : > { %v1300_v59 = vpack.i.b16 %v4753_v58, %v4750_v56  ;;  %v1302_v61 = vshrl.u32 %v4753_v58, 16 }
 0x268   : > { %v4759_v62 = vpack.i.b16 %v1302_v61, %v1301_v60 }
 0x2c6   : > { %v1095_v1 = vpop.permute.xlu1 %1094 }
 0x2c7   : > { %v1113_v4 = vcombine.high %v1095_v1, %v4197_v3  ;;  %v1120_v5 = vrot.slane %v1095_v1, %v4723_v25 }
 0x2c9   : > { %v1127_v7 = vrot.slane %v1113_v4, %v4723_v25  ;;  %v1128_v8 = vcombine.low %v1105_v2, %v1120_v5  ;;  %v1129_v9 = vcombine.high %v1105_v2, %v1120_v5 }
 0x2cb   : > { %v1143_v10 = vrot.slane %v1129_v9, %v4727_v28  ;;  %v1136_v11 = vrot.slane %v1128_v8, %v4727_v28  ;;  %v1144_v12 = vcombine.low %v1112_v6, %v1127_v7  ;;  %v1145_v13 = vcombine.high %v1112_v6, %v1127_v7 }
 0x2cd   : > { %v1166_v14 = vpack.c.bf16 %v1143_v10, %v1143_v10  ;;  %v1164_v15 = vpack.c.bf16 %v1136_v11, %v1136_v11  ;;  %v1161_v16 = vcombine.high %v1143_v10, %v4197_v3  ;;  %v1160_v17 = vcombine.high %v1136_v11, %v4197_v3 }
 0x2ce   : > { %v1152_v18 = vrot.slane %v1144_v12, %v4727_v28  ;;  %v1159_v22 = vrot.slane %v1145_v13, %v4727_v28 }
 0x2cf   : > { %1336 = vxpose.xlu0.c.b16.start.end [1/1] (short) (narrow) %v1166_v14, 16  ;;  %1304 = vxpose.xlu1.c.b16.start.end [1/1] (short) (narrow) %v1164_v15, 16  ;;  %v1167_v19 = vpack.c.bf16 %v1161_v16, %v1161_v16  ;;  %v1165_v20 = vpack.c.bf16 %v1160_v17, %v1160_v17 }
 0x2d0   : > { %v1162_v21 = vcombine.high %v1152_v18, %v4197_v3  ;;  %v1168_v23 = vpack.c.bf16 %v1152_v18, %v1152_v18  ;;  %v1163_v26 = vcombine.high %v1159_v22, %v4197_v3  ;;  %v1170_v27 = vpack.c.bf16 %v1159_v22, %v1159_v22 }
 0x2d2   : > { %v1169_v24 = vpack.c.bf16 %v1162_v21, %v1162_v21  ;;  %v1171_v29 = vpack.c.bf16 %v1163_v26, %v1163_v26 }
 0x2d3   : > { %1352 = vxpose.xlu1.c.b16.start.end [1/1] (short) (narrow) %v1167_v19, 16  ;;  %1320 = vxpose.xlu0.c.b16.start.end [1/1] (short) (narrow) %v1165_v20, 16 }
 0x2d7   : > { %1368 = vxpose.xlu0.c.b16.start.end [1/1] (short) (narrow) %v1168_v23, 16  ;;  %1384 = vxpose.xlu1.c.b16.start.end [1/1] (short) (narrow) %v1169_v24, 16 }
 0x2db   : > { %1400 = vxpose.xlu0.c.b16.start.end [1/1] (short) (narrow) %v1170_v27, 16  ;;  %1416 = vxpose.xlu1.c.b16.start.end [1/1] (short) (narrow) %v1171_v29, 16 }
 0x335   : > { %v1344_v34 = vpop.trf.xlu0  ;;  %v1312_v35 = vpop.trf.xlu1 }
 0x336   : > { %v1436_v45 = vshrl.u32 %v1312_v35, 16  ;;  %v1444_v54 = vshrl.u32 %v1344_v34, 16 }
 0x339   : > { %v1360_v36 = vpop.trf.xlu1  ;;  %v1328_v37 = vpop.trf.xlu0 }
 0x33a   : > { %v1437_v43 = vshrl.u32 %v1328_v37, 16  ;;  %v1434_v44 = vpack.i.b16 %v1328_v37, %v1312_v35  ;;  %v1445_v46 = vshrl.u32 %v1360_v36, 16  ;;  %v1442_v50 = vpack.i.b16 %v1360_v36, %v1344_v34 }
 0x33b   : > { %v4203_v34 = vmov 0  }
 0x33c   : > { %v1438_v55 = vpack.i.b16 %v1437_v43, %v1436_v45  ;;  %v1446_v61 = vpack.i.b16 %v1445_v46, %v1444_v54  ;;  %v3612_v43 = vld [vmem:[%s5179_s4] ss:$0 sm:$0xff] }
 0x33d   : > { %v1376_v38 = vpop.trf.xlu0  ;;  %v1392_v39 = vpop.trf.xlu1 }
 0x33e   : > { %v1452_v40 = vshrl.u32 %v1376_v38, 16  ;;  %v1450_v41 = vpack.i.b16 %v1392_v39, %v1376_v38  ;;  %v1453_v42 = vshrl.u32 %v1392_v39, 16 }
 0x340   : > { %v1454_v47 = vpack.i.b16 %v1453_v42, %v1452_v40  ;;  %v1464_v51 = vcombine.low %v1434_v44, %v1450_v41  ;;  %v1465_v6 = vcombine.high %v1434_v44, %v1450_v41  ;;  %v1009_v44 = vadd.f32 %v3612_v43, %v4775_v30 }
 0x341   : > { %v1408_v48 = vpop.trf.xlu0  ;;  %v1424_v49 = vpop.trf.xlu1 }
 0x342   : > { %v1460_v52 = vshrl.u32 %v1408_v48, 16  ;;  %v1458_v53 = vpack.i.b16 %v1424_v49, %v1408_v48  ;;  %v1461_v57 = vshrl.u32 %v1424_v49, 16  ;;  %v1532_v63 = vcombine.low %v1438_v55, %v1454_v47 }
 0x343   : > { %v1472_v2 = vrot.slane %v1464_v51, %v4723_v25  ;;  %v1533_v14 = vcombine.high %v1438_v55, %v1454_v47  ;;  %v1479_v16 = vrot.slane %v1465_v6, %v4723_v25 }
 0x344   : > { %v1480_v60 = vcombine.low %v1442_v50, %v1458_v53  ;;  %v1462_v0 = vpack.i.b16 %v1461_v57, %v1460_v52  ;;  %v1481_v1 = vcombine.high %v1442_v50, %v1458_v53  ;;  %v1540_v9 = vrot.slane %v1532_v63, %v4723_v25 }
 0x345   : > { %v1547_v22 = vrot.slane %v1533_v14, %v4723_v25 }
 0x346   : > { %v1488_v4 = vrot.slane %v1480_v60, %v4723_v25  ;;  %v1548_v5 = vcombine.low %v1446_v61, %v1462_v0  ;;  %v1549_v8 = vcombine.high %v1446_v61, %v1462_v0  ;;  %v1495_v13 = vrot.slane %v1481_v1, %v4723_v25 }
 0x348   : > { %v1496_v7 = vcombine.low %v1472_v2, %v1488_v4  ;;  %v1556_v10 = vrot.slane %v1548_v5, %v4723_v25  ;;  %v1497_v12 = vcombine.high %v1472_v2, %v1488_v4  ;;  %v1563_v19 = vrot.slane %v1549_v8, %v4723_v25 }
 0x349   : > { %v1512_v21 = vcombine.low %v1479_v16, %v1495_v13  ;;  %v1513_v27 = vcombine.high %v1479_v16, %v1495_v13 }
 0x34a   : > { %v1504_v11 = vrot.slane %v1496_v7, %v4727_v28  ;;  %v1564_v15 = vcombine.low %v1540_v9, %v1556_v10  ;;  %v1565_v18 = vcombine.high %v1540_v9, %v1556_v10  ;;  %v1511_v20 = vrot.slane %v1497_v12, %v4727_v28 }
 0x34b   : > { %v1580_v24 = vcombine.low %v1547_v22, %v1563_v19  ;;  %v1520_v26 = vrot.slane %v1512_v21, %v4727_v28  ;;  %v1581_v31 = vcombine.high %v1547_v22, %v1563_v19  ;;  %v1527_v32 = vrot.slane %v1513_v27, %v4727_v28 }
 0x34c   : > { %1600 = vxpose.xlu0.c.b16.start.end [1/1] (short) (narrow) %v1504_v11, 16  ;;  %v1572_v17 = vrot.slane %v1564_v15, %v4727_v28  ;;  %v1579_v23 = vrot.slane %v1565_v18, %v4727_v28  ;;  %v1528_v35 = vcombine.high %v1504_v11, %v4203_v34  ;;  %v1529_v37 = vcombine.high %v1511_v20, %v4203_v34 }
 0x34d   : > { %v1588_v29 = vrot.slane %v1580_v24, %v4727_v28  ;;  %v1595_v33 = vrot.slane %v1581_v31, %v4727_v28  ;;  %v1530_v39 = vcombine.high %v1520_v26, %v4203_v34  ;;  %v1531_v41 = vcombine.high %v1527_v32, %v4203_v34 }
 0x34e   : > { %1616 = vxpose.xlu1.c.b16.start.end [1/1] (short) (narrow) %v1572_v17, 16  ;;  %v1596_v36 = vcombine.high %v1572_v17, %v4203_v34  ;;  %v1597_v38 = vcombine.high %v1579_v23, %v4203_v34 }
 0x34f   : > { %v1598_v40 = vcombine.high %v1588_v29, %v4203_v34  ;;  %v1599_v42 = vcombine.high %v1595_v33, %v4203_v34 }
 0x350   : > { %1664 = vxpose.xlu0.c.b16.start.end [1/1] (short) (narrow) %v1511_v20, 16 }
 0x352   : > { %1680 = vxpose.xlu1.c.b16.start.end [1/1] (short) (narrow) %v1579_v23, 16 }
 0x354   : > { %1728 = vxpose.xlu0.c.b16.start.end [1/1] (short) (narrow) %v1520_v26, 16 }
 0x356   : > { %1744 = vxpose.xlu1.c.b16.start.end [1/1] (short) (narrow) %v1588_v29, 16 }
 0x358   : > { %1792 = vxpose.xlu0.c.b16.start.end [1/1] (short) (narrow) %v1527_v32, 16 }
 0x35a   : > { %1808 = vxpose.xlu1.c.b16.start.end [1/1] (short) (narrow) %v1595_v33, 16 }
 0x35c   : > { %1632 = vxpose.xlu0.c.b16.start.end [1/1] (short) (narrow) %v1528_v35, 16  ;;  %v1176_v35 = vcombine.high %v1009_v44, %v4197_v3 }
 0x35e   : > { %1648 = vxpose.xlu1.c.b16.start.end [1/1] (short) (narrow) %v1596_v36, 16  ;;  %v1183_v36 = vrot.slane %v1009_v44, %v4723_v25 }
 0x360   : > { %1696 = vxpose.xlu0.c.b16.start.end [1/1] (short) (narrow) %v1529_v37, 16 }
 0x362   : > { %1712 = vxpose.xlu1.c.b16.start.end [1/1] (short) (narrow) %v1597_v38, 16  ;;  %v1190_v38 = vrot.slane %v1176_v35, %v4723_v25 }
 0x364   : > { %1760 = vxpose.xlu0.c.b16.start.end [1/1] (short) (narrow) %v1530_v39, 16 }
 0x366   : > { %1776 = vxpose.xlu1.c.b16.start.end [1/1] (short) (narrow) %v1598_v40, 16 }
 0x368   : > { %1824 = vxpose.xlu0.c.b16.start.end [1/1] (short) (narrow) %v1531_v41, 16 }
 0x36a   : > { %1840 = vxpose.xlu1.c.b16.start.end [1/1] (short) (narrow) %v1599_v42, 16 }
 0x371   : > { %1173 = vrot.lane.b32.xlu0 %v1009_v44, %s4199_s19 }
 0x3b2   : > { %v1608_v45 = vpop.trf.xlu0 }
 0x3b4   : > { %v1624_v46 = vpop.trf.xlu1 }
 0x3b6   : > { %v1672_v47 = vpop.trf.xlu0 }
 0x3b7   : > { %v1856_v63 = vcombine.low %v1608_v45, %v1672_v47 }
 0x3b8   : > { %v1688_v48 = vpop.trf.xlu1 }
 0x3b9   : > { %v1905_v2 = vcombine.low %v1624_v46, %v1688_v48  ;;  %v1863_v7 = vrot.slane %v1856_v63, %v4723_v25 }
 0x3ba   : > { %v1736_v49 = vpop.trf.xlu0 }
 0x3bb   : > { %v1912_v13 = vrot.slane %v1905_v2, %v4723_v25 }
 0x3bc   : > { %v1752_v50 = vpop.trf.xlu1 }
 0x3be   : > { %v1800_v51 = vpop.trf.xlu0 }
 0x3bf   : > { %v1872_v1 = vcombine.low %v1736_v49, %v1800_v51 }
 0x3c0   : > { %v1816_v52 = vpop.trf.xlu1 }
 0x3c1   : > { %v1921_v8 = vcombine.low %v1752_v50, %v1816_v52  ;;  %v1879_v10 = vrot.slane %v1872_v1, %v4723_v25 }
 0x3c2   : > { %v1640_v53 = vpop.trf.xlu0 }
 0x3c3   : > { %v1928_v17 = vrot.slane %v1921_v8, %v4723_v25 }
 0x3c4   : > { %v1656_v54 = vpop.trf.xlu1 }
 0x3c6   : > { %v1704_v55 = vpop.trf.xlu0 }
 0x3c7   : > { %v1864_v60 = vcombine.low %v1640_v53, %v1704_v55 }
 0x3c8   : > { %v1720_v57 = vpop.trf.xlu1 }
 0x3c9   : > { %v1913_v0 = vcombine.low %v1656_v54, %v1720_v57  ;;  %v1871_v4 = vrot.slane %v1864_v60, %v4723_v25 }
 0x3ca   : > { %v1768_v61 = vpop.trf.xlu0 }
 0x3cb   : > { %v1920_v9 = vrot.slane %v1913_v0, %v4723_v25  ;;  %v1888_v14 = vcombine.low %v1863_v7, %v1871_v4 }
 0x3cc   : > { %v1784_v30 = vpop.trf.xlu1 }
 0x3cd   : > { %v1937_v18 = vcombine.low %v1912_v13, %v1920_v9  ;;  %v1895_v22 = vrot.slane %v1888_v14, %v4727_v28 }
 0x3ce   : > { %v1832_v5 = vpop.trf.xlu0 }
 0x3cf   : > { %v1880_v6 = vcombine.low %v1768_v61, %v1832_v5  ;;  %v1944_v24 = vrot.slane %v1937_v18, %v4727_v28 }
 0x3d0   : > { %v1848_v12 = vpop.trf.xlu1 }
 0x3d1   : > { %v1887_v11 = vrot.slane %v1880_v6, %v4723_v25  ;;  %v1929_v15 = vcombine.low %v1784_v30, %v1848_v12 }
 0x3d3   : > { %v1896_v16 = vcombine.low %v1879_v10, %v1887_v11  ;;  %v1936_v19 = vrot.slane %v1929_v15, %v4723_v25 }
 0x3d5   : > { %v1903_v20 = vrot.slane %v1896_v16, %v4727_v28  ;;  %v1945_v21 = vcombine.low %v1928_v17, %v1936_v19 }
 0x3d7   : > { %v1904_v23 = vcombine.low %v1895_v22, %v1903_v20  ;;  %v1952_v26 = vrot.slane %v1945_v21, %v4727_v28 }
 0x3d9   : > { %v1953_v27 = vcombine.low %v1944_v24, %v1952_v26  ;;  %v1958_v31 = vshrl.u32 %v1904_v23, 16 }
 0x3db   : > { %v1956_v29 = vpack.i.b16 %v1953_v27, %v1904_v23  ;;  %v1959_v32 = vshrl.u32 %v1953_v27, 16 }
 0x3dd   : > { %3696 = vmatpush3.bf16.msra.mxu0 %v1956_v29  ;;  %v1960_v33 = vpack.i.b16 %v1959_v32, %v1958_v31 }
 0x3de   : > { %3707 = vmatprep.subr.bf16.mxu0 %v4197_v3 }
 0x3df   : > { %3702 = vmatpush3.bf16.msra.mxu1 %v1960_v33 }
 0x3e0   : > { %3698 = vmatmul.mubr.msk.bf16.vlgmr.msra.gmra.mrb[0].mxu0 %vm1962_vm3, %v1300_v59  ;;  %3713 = vmatprep.subr.bf16.mxu1 %v4197_v3 }
 0x3e1   : > { %3709 = vmatprep.mubr.msk.bf16.mxu0 %vm4198_vm1, %v4197_v3 }
 0x3e2   : > { %3704 = vmatmul.mubr.msk.bf16.vlgmr.msra.gmra.mrb[8].mxu1 %vm1962_vm3, %v4759_v62 }
 0x3e3   : > { %v1174_v37 = vpop.permute.xlu0 %1173  ;;  %3715 = vmatprep.mubr.msk.bf16.mxu1 %vm4198_vm1, %v4197_v3 }
 0x3e4   : > { %v1191_v39 = vcombine.high %v1174_v37, %v4197_v3  ;;  %v1198_v40 = vrot.slane %v1174_v37, %v4723_v25 }
 0x3e6   : > { %v1205_v56 = vrot.slane %v1191_v39, %v4723_v25  ;;  %v1206_v58 = vcombine.low %v1183_v36, %v1198_v40  ;;  %v1207_v59 = vcombine.high %v1183_v36, %v1198_v40 }
 0x3e8   : > { %v1223_v41 = vcombine.high %v1190_v38, %v1205_v56  ;;  %v1214_v42 = vrot.slane %v1206_v58, %v4727_v28  ;;  %v1221_v43 = vrot.slane %v1207_v59, %v4727_v28  ;;  %v1222_v62 = vcombine.low %v1190_v38, %v1205_v56 }
 0x3ea   : > { %v1242_v44 = vpack.c.bf16 %v1214_v42, %v1214_v42  ;;  %v1238_v45 = vcombine.high %v1214_v42, %v4197_v3  ;;  %v1230_v46 = vrot.slane %v1222_v62, %v4727_v28  ;;  %v1244_v47 = vpack.c.bf16 %v1221_v43, %v1221_v43 }
 0x3eb   : > { %v1239_v49 = vcombine.high %v1221_v43, %v4197_v3  ;;  %v1237_v4 = vrot.slane %v1223_v41, %v4727_v28 }
 0x3ec   : > { %2074 = vxpose.xlu1.c.b16.start.end [1/1] (short) (narrow) %v1242_v44, 16  ;;  %v1243_v48 = vpack.c.bf16 %v1238_v45, %v1238_v45  ;;  %v1246_v50 = vpack.c.bf16 %v1230_v46, %v1230_v46  ;;  %v1240_v52 = vcombine.high %v1230_v46, %v4197_v3 }
 0x3ed   : > { %v1245_v51 = vpack.c.bf16 %v1239_v49, %v1239_v49  ;;  %v1241_v5 = vcombine.high %v1237_v4, %v4197_v3  ;;  %v1248_v6 = vpack.c.bf16 %v1237_v4, %v1237_v4 }
 0x3ee   : > { %2090 = vxpose.xlu0.c.b16.start.end [1/1] (short) (narrow) %v1243_v48, 16  ;;  %v1247_v53 = vpack.c.bf16 %v1240_v52, %v1240_v52 }
 0x3ef   : > { %v1249_v7 = vpack.c.bf16 %v1241_v5, %v1241_v5 }
 0x3f0   : > { %2106 = vxpose.xlu1.c.b16.start.end [1/1] (short) (narrow) %v1244_v47, 16 }
 0x3f2   : > { %2138 = vxpose.xlu0.c.b16.start.end [1/1] (short) (narrow) %v1246_v50, 16 }
 0x3f4   : > { %2122 = vxpose.xlu1.c.b16.start.end [1/1] (short) (narrow) %v1245_v51, 16 }
 0x3f8   : > { %2154 = vxpose.xlu1.c.b16.start.end [1/1] (short) (narrow) %v1247_v53, 16 }
 0x452   : > { %v2082_v8 = vpop.trf.xlu1 }
 0x453   : > { %v2206_v14 = vshrl.u32 %v2082_v8, 16 }
 0x454   : > { %v2098_v10 = vpop.trf.xlu0 }
 0x455   : > { %v2207_v15 = vshrl.u32 %v2098_v10, 16  ;;  %v2204_v20 = vpack.i.b16 %v2098_v10, %v2082_v8 }
 0x456   : > { %v2114_v9 = vpop.trf.xlu1 }
 0x457   : > { %v2208_v22 = vpack.i.b16 %v2207_v15, %v2206_v14  ;;  %v2214_v24 = vshrl.u32 %v2114_v9, 16 }
 0x458   : > { %v2146_v12 = vpop.trf.xlu0 }
 0x459   : > { %v2222_v17 = vshrl.u32 %v2146_v12, 16 }
 0x45a   : > { %v2130_v11 = vpop.trf.xlu1 }
 0x45b   : > { %v2215_v26 = vshrl.u32 %v2130_v11, 16  ;;  %v2212_v32 = vpack.i.b16 %v2130_v11, %v2114_v9 }
 0x45d   : > { %v2216_v37 = vpack.i.b16 %v2215_v26, %v2214_v24 }
 0x45e   : > { %v2162_v13 = vpop.trf.xlu1 }
 0x45f   : > { %v2223_v18 = vshrl.u32 %v2162_v13, 16  ;;  %v2220_v21 = vpack.i.b16 %v2162_v13, %v2146_v12 }
 0x461   : > { %v2224_v27 = vpack.i.b16 %v2223_v18, %v2222_v17  ;;  %v2234_v33 = vcombine.low %v2204_v20, %v2220_v21  ;;  %v2235_v49 = vcombine.high %v2204_v20, %v2220_v21 }
 0x463   : > { %v2302_v38 = vcombine.low %v2208_v22, %v2224_v27  ;;  %v2242_v58 = vrot.slane %v2234_v33, %v4723_v25  ;;  %v2303_v53 = vcombine.high %v2208_v22, %v2224_v27 }
 0x465   : > { %v2310_v42 = vrot.slane %v2302_v38, %v4723_v25 }
 0x4b3   : > { %v4844_v54 = vpop.f32.mrb[0].mxu0 }
 0x4b4   : > { %v3699_v55 = vpop.f32.mrb[1].mxu0  ;;  %v2050_v57 = vsel %vm2049_vm4, %v4844_v54, -inf }
 0x4b5   : > { %v2003_v60 = vpop.f32.mrb[2].mxu0  ;;  %2051 = vmax.xlane.f32.xlu0 %v2050_v57  ;;  %v4848_v61 = vpop.f32.mrb[8].mxu1 }
 0x4b6   : > { %v3700_v63 = vpop.f32.mrb[3].mxu0  ;;  %v3705_v0 = vpop.f32.mrb[9].mxu1  ;;  %v2053_v1 = vsel %vm2049_vm4, %v4848_v61, -inf }
 0x4b7   : > { %2054 = vmax.xlane.f32.xlu1 %v2053_v1  ;;  %v2046_v30 = vpop.f32.mrb[10].mxu1  ;;  %v2249_v63 = vrot.slane %v2235_v49, %v4723_v25 }
 0x4b8   : > { %v3706_v2 = vpop.f32.mrb[11].mxu1 }
 0x4b9   : > { %v2317_v2 = vrot.slane %v2303_v53, %v4723_v25 }
 0x4e2   : > { %2170 = vxpose.xlu0.c.b16.start.end [1/1] (short) (narrow) %v1248_v6, 16 }
 0x4e4   : > { %2186 = vxpose.xlu1.c.b16.start.end [1/1] (short) (narrow) %v1249_v7, 16 }
 0x542   : > { %v4854_v16 = vpop.xlane.xlu0 %2051 }
 0x543   : > { %v2056_v7 = vsub.f32 %v4844_v54, %v4854_v16 }
 0x544   : > { %v4856_v19 = vpop.xlane.xlu1 %2054 }
 0x545   : > { %v2057_v9 = vsub.f32 %v4848_v61, %v4856_v19  ;;  %v2058_v12 = vmul.f32 1.442695, %v2056_v7 }
 0x547   : > { %v2060_v15 = vmul.f32 1.442695, %v2057_v9  ;;  %3891 = vpow2.f32 %v2058_v12 }
 0x548   : > { %v2178_v23 = vpop.trf.xlu0 }
 0x549   : > { %v2230_v29 = vshrl.u32 %v2178_v23, 16  ;;  %3893 = vpow2.f32 %v2060_v15 }
 0x54a   : > { %v2194_v31 = vpop.trf.xlu1 }
 0x54b   : > { %v2228_v35 = vpack.i.b16 %v2194_v31, %v2178_v23  ;;  %v2231_v36 = vshrl.u32 %v2194_v31, 16 }
 0x54d   : > { %v2232_v39 = vpack.i.b16 %v2231_v36, %v2230_v29  ;;  %v2250_v40 = vcombine.low %v2212_v32, %v2228_v35  ;;  %v2251_v46 = vcombine.high %v2212_v32, %v2228_v35 }
 0x54f   : > { %v2318_v56 = vcombine.low %v2216_v37, %v2232_v39  ;;  %v2258_v59 = vrot.slane %v2250_v40, %v4723_v25  ;;  %v2319_v50 = vcombine.high %v2216_v37, %v2232_v39  ;;  %v2265_v57 = vrot.slane %v2251_v46, %v4723_v25 }
 0x551   : > { %v2266_v41 = vcombine.low %v2242_v58, %v2258_v59  ;;  %v2326_v43 = vrot.slane %v2318_v56, %v4723_v25  ;;  %v2267_v48 = vcombine.high %v2242_v58, %v2258_v59  ;;  %v2333_v0 = vrot.slane %v2319_v50, %v4723_v25  ;;  %v3892_v61 = vpop.eup %3891 }
 0x552   : > { %v2282_v30 = vcombine.low %v2249_v63, %v2265_v57  ;;  %v2283_v11 = vcombine.high %v2249_v63, %v2265_v57  ;;  %v2062_v18 = vsel %vm2049_vm4, %v3892_v61, 0.0 }
 0x553   : > { %v2274_v62 = vrot.slane %v2266_v41, %v4727_v28  ;;  %v2334_v44 = vcombine.low %v2310_v42, %v2326_v43  ;;  %v2335_v52 = vcombine.high %v2310_v42, %v2326_v43  ;;  %v2281_v55 = vrot.slane %v2267_v48, %v4727_v28  ;;  %v3894_v16 = vpop.eup %3893 }
 0x554   : > { %v2350_v5 = vcombine.low %v2317_v2, %v2333_v0  ;;  %v2290_v6 = vrot.slane %v2282_v30, %v4727_v28  ;;  %v2351_v14 = vcombine.high %v2317_v2, %v2333_v0  ;;  %v2297_v17 = vrot.slane %v2283_v11, %v4727_v28 }
 0x555   : > { %2370 = vxpose.xlu0.c.b16.start.end [1/1] (short) (narrow) %v2274_v62, 16  ;;  %v2342_v45 = vrot.slane %v2334_v44, %v4727_v28  ;;  %v2298_v47 = vcombine.high %v2274_v62, %v4203_v34  ;;  %v2349_v60 = vrot.slane %v2335_v52, %v4727_v28  ;;  %v2299_v1 = vcombine.high %v2281_v55, %v4203_v34 }
 0x556   : > { %v2358_v8 = vrot.slane %v2350_v5, %v4727_v28  ;;  %v2300_v10 = vcombine.high %v2290_v6, %v4203_v34  ;;  %v2365_v54 = vrot.slane %v2351_v14, %v4727_v28  ;;  %v2065_v19 = vsel %vm2049_vm4, %v3894_v16, 0.0 }
 0x557   : > { %2386 = vxpose.xlu1.c.b16.start.end [1/1] (short) (narrow) %v2342_v45, 16  ;;  %v2366_v51 = vcombine.high %v2342_v45, %v4203_v34  ;;  %v2367_v4 = vcombine.high %v2349_v60, %v4203_v34  ;;  %v2301_v20 = vcombine.high %v2297_v17, %v4203_v34 }
 0x558   : > { %v2368_v13 = vcombine.high %v2358_v8, %v4203_v34  ;;  %v2369_v21 = vcombine.high %v2365_v54, %v4203_v34 }
 0x559   : > { %2402 = vxpose.xlu0.c.b16.start.end [1/1] (short) (narrow) %v2298_v47, 16 }
 0x55b   : > { %2418 = vxpose.xlu1.c.b16.start.end [1/1] (short) (narrow) %v2366_v51, 16 }
 0x55d   : > { %2434 = vxpose.xlu0.c.b16.start.end [1/1] (short) (narrow) %v2281_v55, 16 }
 0x55f   : > { %2450 = vxpose.xlu1.c.b16.start.end [1/1] (short) (narrow) %v2349_v60, 16 }
 0x561   : > { %2466 = vxpose.xlu0.c.b16.start.end [1/1] (short) (narrow) %v2299_v1, 16 }
 0x563   : > { %2482 = vxpose.xlu1.c.b16.start.end [1/1] (short) (narrow) %v2367_v4, 16 }
 0x565   : > { %2498 = vxpose.xlu0.c.b16.start.end [1/1] (short) (narrow) %v2290_v6, 16 }
 0x567   : > { %2514 = vxpose.xlu1.c.b16.start.end [1/1] (short) (narrow) %v2358_v8, 16 }
 0x569   : > { %2530 = vxpose.xlu0.c.b16.start.end [1/1] (short) (narrow) %v2300_v10, 16 }
 0x56b   : > { %2546 = vxpose.xlu1.c.b16.start.end [1/1] (short) (narrow) %v2368_v13, 16 }
 0x56d   : > { %2562 = vxpose.xlu0.c.b16.start.end [1/1] (short) (narrow) %v2297_v17, 16 }
 0x56f   : > { %2578 = vxpose.xlu1.c.b16.start.end [1/1] (short) (narrow) %v2365_v54, 16 }
 0x57a   : > { %2063 = vadd.xlane.f32.xlu0 %v2062_v18 }
 0x57c   : > { %2066 = vadd.xlane.f32.xlu1 %v2065_v19 }
 0x5a7   : > { %2594 = vxpose.xlu0.c.b16.start.end [1/1] (short) (narrow) %v2301_v20, 16 }
 0x5a9   : > { %2610 = vxpose.xlu1.c.b16.start.end [1/1] (short) (narrow) %v2369_v21, 16 }
 0x5bb   : > { %v2378_v22 = vpop.trf.xlu0 }
 0x5bd   : > { %v2394_v23 = vpop.trf.xlu1 }
 0x5bf   : > { %v2410_v24 = vpop.trf.xlu0 }
 0x5c1   : > { %v2426_v26 = vpop.trf.xlu1 }
 0x5c3   : > { %v2442_v27 = vpop.trf.xlu0 }
 0x5c4   : > { %v2626_v59 = vcombine.low %v2378_v22, %v2442_v27 }
 0x5c5   : > { %v2458_v29 = vpop.trf.xlu1 }
 0x5c6   : > { %v2675_v34 = vcombine.low %v2394_v23, %v2458_v29  ;;  %v2633_v47 = vrot.slane %v2626_v59, %v4723_v25 }
 0x5c7   : > { %v2474_v31 = vpop.trf.xlu0 }
 0x5c8   : > { %v2634_v41 = vcombine.low %v2410_v24, %v2474_v31  ;;  %v2682_v62 = vrot.slane %v2675_v34, %v4723_v25 }
 0x5c9   : > { %v2490_v32 = vpop.trf.xlu1 }
 0x5ca   : > { %v2683_v58 = vcombine.low %v2426_v26, %v2490_v32  ;;  %v2641_v48 = vrot.slane %v2634_v41, %v4723_v25  ;;  %v3883_v26 = vld [vmem:[%s4668_s9] sm:$0xff]  }
 0x5cb   : > { %v2506_v33 = vpop.trf.xlu0 }
 0x5cc   : > { %v2690_v44 = vrot.slane %v2683_v58, %v4723_v25  ;;  %v2658_v0 = vcombine.low %v2633_v47, %v2641_v48 }
 0x5cd   : > { %v2522_v35 = vpop.trf.xlu1 }
 0x5ce   : > { %v2707_v55 = vcombine.low %v2682_v62, %v2690_v44  ;;  %v2665_v9 = vrot.slane %v2658_v0, %v4727_v28  ;;  %v3884_v62 = vld [vmem:[%s4668_s9 + $0x8] sm:$0xff]   ;;  %s4204_s9 = smov 16  }
 0x5cf   : > { %v2538_v36 = vpop.trf.xlu0 }
 0x5d0   : > { %v2714_v7 = vrot.slane %v2707_v55, %v4727_v28 }
 0x5d1   : > { %v2554_v37 = vpop.trf.xlu1 }
 0x5d3   : > { %v2570_v38 = vpop.trf.xlu0 }
 0x5d4   : > { %v2642_v42 = vcombine.low %v2506_v33, %v2570_v38 }
 0x5d5   : > { %v2586_v39 = vpop.trf.xlu1 }
 0x5d6   : > { %v2691_v45 = vcombine.low %v2522_v35, %v2586_v39  ;;  %v2649_v50 = vrot.slane %v2642_v42, %v4723_v25 }
 0x5d8   : > { %v2698_v57 = vrot.slane %v2691_v45, %v4723_v25 }
 0x607   : > { %v2064_v40 = vpop.xlane.xlu0 %2063 }
 0x608   : > { %3895 = vrcp.f32 %v2064_v40 }
 0x609   : > { %v2067_v56 = vpop.xlane.xlu1 %2066 }
 0x60a   : > { %3897 = vrcp.f32 %v2067_v56 }
 0x60d   : > { %v2602_v43 = vpop.trf.xlu0 }
 0x60e   : > { %v2650_v46 = vcombine.low %v2538_v36, %v2602_v43 }
 0x60f   : > { %v2618_v49 = vpop.trf.xlu1 }
 0x610   : > { %v2657_v51 = vrot.slane %v2650_v46, %v4723_v25  ;;  %v2699_v52 = vcombine.low %v2554_v37, %v2618_v49 }
 0x612   : > { %v3896_v53 = vpop.eup %3895  ;;  %v2666_v60 = vcombine.low %v2649_v50, %v2657_v51  ;;  %v2706_v63 = vrot.slane %v2699_v52, %v4723_v25 }
 0x613   : > { %v2070_v1 = vmul.f32 %v3896_v53, %v3892_v61 }
 0x614   : > { %v3898_v30 = vpop.eup %3897  ;;  %v2715_v2 = vcombine.low %v2698_v57, %v2706_v63  ;;  %v2673_v4 = vrot.slane %v2666_v60, %v4727_v28 }
 0x615   : > { %v2072_v5 = vpack.c.bf16 %v2070_v1, %v2070_v1  ;;  %v2071_v6 = vmul.f32 %v3898_v30, %v3894_v16 }
 0x616   : > { %v2722_v8 = vrot.slane %v2715_v2, %v4727_v28  ;;  %v2674_v13 = vcombine.low %v2665_v9, %v2673_v4 }
 0x617   : > { %v2734_v10 = vsel %vm2049_vm4, %v2072_v5, 0  ;;  %v2073_v11 = vpack.c.bf16 %v2071_v6, %v2071_v6  ;;  %v3903_v5 = vld [vmem:[#allocation2] sm:$0xff] }
 0x618   : > { %v2723_v12 = vcombine.low %v2714_v7, %v2722_v8  ;;  %3708 = vmatpush3.bf16.xpose.msra.mxu0 %v2734_v10  ;;  %v2727_v17 = vshrl.u32 %v2674_v13, 16 }
 0x619   : > { %v2781_v14 = vsel %vm2049_vm4, %v2073_v11, 0  ;;  %3719 = vmatprep.subr.bf16.mxu0 %v4197_v3 }
 0x61a   : > { %3714 = vmatpush3.bf16.xpose.msra.mxu1 %v2781_v14  ;;  %v2728_v15 = vshrl.u32 %v2723_v12, 16  ;;  %v2726_v54 = vpack.i.b16 %v2723_v12, %v2674_v13  ;;  %v3885_v13 = vld [vmem:[%s4638_s11] sm:$0xff]   ;;  %v3886_v14 = vld [vmem:[%s4638_s11 + $0x8] sm:$0xff]  }
 0x61b   : > { %3727 = vmatprep.subr.bf16.mxu1 %v4197_v3 }
 0x61c   : > { %v2729_v61 = vpack.i.b16 %v2728_v15, %v2727_v17  ;;  %v3887_v15 = vld [vmem:[%s4678_s23] sm:$0xff]   ;;  %v3888_v17 = vld [vmem:[%s4678_s23 + $0x8] sm:$0xff]  }
 0x61f   : > { %3710 = vmatmul.mubr.msk.bf16.vlgmr.msra.gmra.mrb[4].mxu0 %vm2049_vm4, %v2726_v54 }
 0x620   : > { %3723 = vmatprep.mubr.msk.bf16.mxu0 %vm4198_vm1, %v4197_v3  ;;  %3720 = vmatpush3.bf16.msra.mxu0 %v3883_v26  ;;  %v3889_v26 = vld [vmem:[%s4678_s23 + $0x10] sm:$0xff]  }
 0x621   : > { %3716 = vmatmul.mubr.msk.bf16.vlgmr.msra.gmra.mrb[12].mxu1 %vm2049_vm4, %v2729_v61  ;;  %3721 = vmatprep.subr.bf16.mxu0 %v4197_v3 }
 0x622   : > { %3731 = vmatprep.mubr.msk.bf16.mxu1 %vm4198_vm1, %v4197_v3  ;;  %3728 = vmatpush3.bf16.msra.mxu1 %v3885_v13 }
 0x623   : > { %3729 = vmatprep.subr.bf16.mxu1 %v4197_v3 }
 0x624   : > { %3722 = vmatpush3.bf16.msra.mxu0 %v3884_v62 }
 0x625   : > { %3735 = vmatprep.subr.bf16.mxu0 %v4197_v3 }
 0x626   : > { %3730 = vmatpush3.bf16.msra.mxu1 %v3886_v14 }
 0x6f2   : > { %v2770_v16 = vpop.f32.mrb[4].mxu0 }
 0x6f3   : > { %2824 = vxpose.xlu0.b32.start [1/2] (short) (narrow) %v2770_v16, 8  ;;  %v3711_v18 = vpop.f32.mrb[5].mxu0 }
 0x6f4   : > { %v2773_v19 = vpop.f32.mrb[6].mxu0  ;;  %v2817_v20 = vpop.f32.mrb[12].mxu1 }
 0x6f5   : > { %v3712_v21 = vpop.f32.mrb[7].mxu0  ;;  %2856 = vxpose.xlu1.b32.start [1/2] (short) (narrow) %v2817_v20, 8  ;;  %v3717_v22 = vpop.f32.mrb[13].mxu1 }
 0x6f6   : > { %v2820_v23 = vpop.f32.mrb[14].mxu1  ;;  %v3631_v21 = vld [vmem:[%s859_s3] ss:$0 sm:$0xff] }
 0x6f7   : > { %2825 = vxpose.xlu0.b32.end [2/2] (short) (narrow) %v2773_v19, 8  ;;  %v3718_v24 = vpop.f32.mrb[15].mxu1  ;;  %v3630_v19 = vld [vmem:[%s856_s17] ss:$0 sm:$0xff] }
 0x6f9   : > { %2857 = vxpose.xlu1.b32.end [2/2] (short) (narrow) %v2820_v23, 8 }
 0x773   : > { %v2840_v27 = vpop.trf.xlu0 }
 0x774   : > { %v2888_v29 = vcombine.high %v2840_v27, %v4197_v3  ;;  %v2895_v31 = vrot.slane %v2840_v27, %v4723_v25  ;;  %v3890_v27 = vld [vmem:[%s4678_s23 + $0x18] sm:$0xff]  }
 0x775   : > { %v2872_v32 = vpop.trf.xlu1 }
 0x776   : > { %v2902_v33 = vrot.slane %v2888_v29, %v4723_v25  ;;  %v2903_v35 = vcombine.high %v2872_v32, %v4197_v3  ;;  %v2910_v36 = vrot.slane %v2872_v32, %v4723_v25  ;;  %v3632_v29 = vld [vmem:[%s717_s22] ss:$0 sm:$0xff] }
 0x778   : > { %v2917_v37 = vrot.slane %v2903_v35, %v4723_v25  ;;  %v2918_v38 = vcombine.low %v2895_v31, %v2910_v36  ;;  %v2919_v39 = vcombine.high %v2895_v31, %v2910_v36 }
 0x77a   : > { %v2926_v40 = vrot.slane %v2918_v38, %v4727_v28  ;;  %v2933_v56 = vrot.slane %v2919_v39, %v4727_v28  ;;  %v2934_v34 = vcombine.low %v2902_v33, %v2917_v37  ;;  %v2935_v58 = vcombine.high %v2902_v33, %v2917_v37  ;;  %v3636_v39 = vld [vmem:[%s5184_s29] ss:$0 sm:$0xff] }
 0x77c   : > { %v2942_v59 = vrot.slane %v2934_v34, %v4727_v28  ;;  %v2949_v41 = vrot.slane %v2935_v58, %v4727_v28  ;;  %v2954_v42 = vcombine.low %v2926_v40, %v2933_v56  ;;  %v3624_v43 = vcombine.high %v2926_v40, %v2933_v56 }
 0x77e   : > { %v2961_v44 = vrot.slane %v2954_v42, %v4723_v25  ;;  %v2969_v45 = vrot.slane %v3624_v43, %v4723_v25  ;;  %v2970_v46 = vcombine.low %v2942_v59, %v2949_v41  ;;  %v3625_v47 = vcombine.high %v2942_v59, %v2949_v41 }
 0x780   : > { %v2977_v48 = vrot.slane %v2970_v46, %v4723_v25  ;;  %v2985_v49 = vrot.slane %v3625_v47, %v4723_v25  ;;  %v2986_v50 = vcombine.low %v2961_v44, %v2969_v45  ;;  %v3626_v25 = vld [vmem:[%s5180_s18] ss:$0 sm:$0xff] }
 0x782   : > { %v2994_v51 = vcombine.low %v2977_v48, %v2985_v49  ;;  %v2993_v52 = vrot.slane %v2986_v50, %v4727_v28  ;;  %v3642_v50 = vld [vmem:[%s862_s26] ss:$0 sm:$0xff] }
 0x784   : > { %v3001_v53 = vrot.slane %v2994_v51, %v4727_v28 }
 0x786   : > { %v3003_v55 = vcombine.high %v2993_v52, %v3001_v53  ;;  %v3002_v57 = vcombine.low %v2993_v52, %v3001_v53  ;;  %v3643_v52 = vld [vmem:[%s865_s20] ss:$0 sm:$0xff] }
 0x788   : > { %3005 = vrot.lane.b32.xlu0 %v3003_v55, %s4204_s9 }
 0x7fa   : > { %v3006_v60 = vpop.permute.xlu0 %3005 }
 0x7fb   : > { %v3008_v63 = vsel %vm1962_vm3, %v3002_v57, %v3006_v60 }
 0x7fc   : > { %v3009_v0 = vpack.c.bf16 %v3008_v63, %v3008_v63 }
 0x7fe   : > { %3724 = vmatmul.mubr.msk.bf16.vlgmr.msra.gmra.mrb[8].mxu0 %vm904_vm2, %v3009_v0 }
 0x7ff   : > { %3743 = vmatprep.mubr.msk.bf16.mxu0 %vm4198_vm1, %v4197_v3  ;;  %3736 = vmatpush3.bf16.msra.mxu0 %v3887_v15 }
 0x800   : > { %3737 = vmatprep.subr.bf16.mxu0 %v4197_v3 }
 0x803   : > { %3738 = vmatpush3.bf16.msra.mxu0 %v3888_v17 }
 0x804   : > { %3739 = vmatprep.subr.bf16.mxu0 %v4197_v3 }
 0x807   : > { %3740 = vmatpush3.bf16.msra.mxu0 %v3889_v26 }
 0x808   : > { %3741 = vmatprep.subr.bf16.mxu0 %v4197_v3 }
 0x80b   : > { %3742 = vmatpush3.bf16.msra.mxu0 %v3890_v27 }
 0x8d1   : > { %v3070_v1 = vpop.f32.mrb[8].mxu0 }
 0x8d2   : > { %v3071_v30 = vadd.f32 %v3626_v25, %v3070_v1  ;;  %v3725_v28 = vpop.f32.mrb[9].mxu0 }
 0x8d3   : > { %v3073_v2 = vpop.f32.mrb[10].mxu0 }
 0x8d4   : > { %v3726_v4 = vpop.f32.mrb[11].mxu0  ;;  %v3076_v6 = vadd.f32 %v3903_v5, %v3071_v30 }
 0x8d6   : > { %v3077_v7 = vsel %vm904_vm2, %v3076_v6, 0.0 }
 0x8d7   : > { %3078 = vadd.xlane.f32.xlu1 %v3077_v7 }
 0x964   : > { %v3079_v8 = vpop.xlane.xlu1 %3078 }
 0x965   : > { %v3081_v9 = vmul.f32 0.03125, %v3079_v8 }
 0x967   : > { %v3082_v10 = vsub.f32 %v3076_v6, %v3081_v9 }
 0x969   : > { %v3083_v11 = vmul.f32 %v3082_v10, %v3082_v10 }
 0x96b   : > { %v3084_v12 = vsel %vm904_vm2, %v3083_v11, 0.0 }
 0x96c   : > { %3085 = vadd.xlane.f32.xlu0 %v3084_v12 }
 0x9f9   : > { %v3086_v54 = vpop.xlane.xlu0 %3085 }
 0x9fa   : > { %v3087_v61 = vmul.f32 0.03125, %v3086_v54 }
 0x9fc   : > { %v3088_v16 = vadd.f32 1e-05, %v3087_v61 }
 0x9fe   : > { %3899 = vrsqrt.f32 %v3088_v16 }
 0xa08   : > { %v3900_v18 = vpop.eup %3899 }
 0xa09   : > { %v3090_v20 = vmul.f32 %v3900_v18, %v3082_v10 }
 0xa0b   : > { %v3098_v22 = vmul.f32 %v3630_v19, %v3090_v20 }
 0xa0d   : > { %v3106_v23 = vadd.f32 %v3631_v21, %v3098_v22 }
 0xa0f   : > { %v3107_v24 = vpack.c.bf16 %v3106_v23, %v3106_v23 }
 0xa11   : > { %3732 = vmatmul.mubr.msk.bf16.vlgmr.msra.gmra.mrb[16].mxu1 %vm904_vm2, %v3107_v24 }
 0xae4   : > { %v3168_v31 = vpop.f32.mrb[16].mxu1 }
 0xae5   : > { %v3169_v32 = vadd.f32 %v3632_v29, %v3168_v31  ;;  %v3733_v33 = vpop.f32.mrb[17].mxu1 }
 0xae6   : > { %v3171_v35 = vpop.f32.mrb[18].mxu1 }
 0xae7   : > { %v3174_v36 = vmax.f32 %v3169_v32, 0.0  ;;  %v3734_v37 = vpop.f32.mrb[19].mxu1 }
 0xae9   : > { %v3175_v38 = vpack.c.bf16 %v3174_v36, %v3174_v36 }
 0xaeb   : > { %3744 = vmatmul.mubr.msk.bf16.vlgmr.msra.gmra.mrb[12].mxu0 %vm3215_vm5, %v3175_v38 }
 0xbbe   : > { %v3253_v40 = vpop.f32.mrb[12].mxu0 }
 0xbbf   : > { %v3254_v3 = vadd.f32 %v3636_v39, %v3253_v40  ;;  %v3745_v56 = vpop.f32.mrb[13].mxu0 }
 0xbc0   : > { %v3256_v34 = vpop.f32.mrb[14].mxu0 }
 0xbc1   : > { %v3746_v58 = vpop.f32.mrb[15].mxu0  ;;  %v3259_v59 = vadd.f32 %v3254_v3, %v3106_v23 }
 0xbc3   : > { %v3260_v41 = vsel %vm904_vm2, %v3259_v59, 0.0 }
 0xbc4   : > { %3261 = vadd.xlane.f32.xlu1 %v3260_v41 }
 0xc51   : > { %v3262_v42 = vpop.xlane.xlu1 %3261 }
 0xc52   : > { %v3263_v43 = vmul.f32 0.03125, %v3262_v42 }
 0xc54   : > { %v3264_v62 = vsub.f32 %v3259_v59, %v3263_v43 }
 0xc56   : > { %v3265_v44 = vmul.f32 %v3264_v62, %v3264_v62 }
 0xc58   : > { %v3266_v45 = vsel %vm904_vm2, %v3265_v44, 0.0 }
 0xc59   : > { %3267 = vadd.xlane.f32.xlu1 %v3266_v45 }
 0xce6   : > { %v3268_v46 = vpop.xlane.xlu1 %3267 }
 0xce7   : > { %v3269_v47 = vmul.f32 0.03125, %v3268_v46 }
 0xce9   : > { %v3270_v48 = vadd.f32 1e-05, %v3269_v47 }
 0xceb   : > { %3901 = vrsqrt.f32 %v3270_v48 }
 0xcf5   : > { %v3902_v49 = vpop.eup %3901 }
 0xcf6   : > { %v3272_v51 = vmul.f32 %v3902_v49, %v3264_v62  ;;  %3293 = sbr.rel (%p3644_p5) target bundleno = 3325 (0xcfd), region = 112 }
 0xcf8   : > { %v3280_v53 = vmul.f32 %v3642_v50, %v3272_v51 }
 0xcfa   : > { %v3288_v55 = vadd.f32 %v3643_v52, %v3280_v53 }
 0xcfc   : > { %3289 = vst.msk [vmem:[#allocation2] sm:$0xff] %vm904_vm2, %v3288_v55  ;;  %3294 = vst.msk [vmem:[%s824_s0] sm:$0xff] (!%p3644_p5), %vm904_vm2, %v3288_v55 }
 0xcfd PF: > { %s5188_s19 = sld [smem:[#allocation25_spill]]  ;;  %s5189_s26 = sld [smem:[#allocation34_spill]] }
 0xcfe   : > { %s5190_s20 = sld [smem:[#allocation52_spill]]  ;;  %s3309_s24 = sshll.u32 %s824_s0, 4  ;;  %s3310_s24 = int_to_ptr.vmem [resolvable:$true] %s3309_s24 }
 0xcff   : > { %s3296_s4 = scalar_lea.sflag [#allocation6], %s4612_s2  ;;  %s4054_s9 = scalar_lea.vmem %s3310_s24, 128 }
 0xd00   : > { %p4055_p8 = scmp.ne.s32.totalorder %s3310_s24, %s4054_s9  ;;  %s4205_s18 = smov [#allocation13]  }
 0xd01   : > { %s4058_s11 = sshll.u32 %s4205_s18, 4  ;;  %s4059_s11 = int_to_ptr.vmem [resolvable:$false] %s4058_s11 }
 0xd02   : > { %s4060_s7 = scalar_lea.vmem %s4059_s11, 256  ;;  %p4061_p2 = scmp.lt.s32.totalorder %s3310_s24, %s4059_s11 }
 0xd03   : > { %s3646_s15 = sshll.u32 %s5188_s19, 7  ;;  %p5191_p1 = scmp.ne.s32.totalorder %s5189_s26, 0 }
 0xd04   : > { %s4987_s14 = scalar_lea.hbm %s5190_s20, %s3646_s15  ;;  %p4062_p10 = scmp.lt.s32.totalorder %s4060_s7, %s4054_s9 }
 0xd05   : > { %p4056_p12 = pnand %p4055_p8, %p5191_p1 }
 0xd06   : > { %p4063_p4 = por %p4062_p10, %p4061_p2 }
 0xd07   : > { %p4057_p9 = pneg %p4056_p12 }
 0xd09   : > { %p4064_p6 = pnand %p4063_p4, %p4057_p9 }
 0xd0b   : > { %4067 = shalt.err (!%p4064_p6)
}
 0xd0c   : > { %s4068_s2 = scalar_lea.hbm %s4987_s14, 128  ;;  %s4072_s10 = scalar_lea.hbm %s5190_s20, 256 }
 0xd0d   : > { %p4069_p11 = scmp.ne.s32.totalorder %s4987_s14, %s4068_s2  ;;  %p4073_p7 = scmp.lt.u32.totalorder %s4987_s14, %s5190_s20 }
 0xd0e   : > { %p4074_p3 = scmp.lt.u32.totalorder %s4072_s10, %s4068_s2  ;;  %p4076_p8 = scmp.lt.u32.totalorder %s4068_s2, %s4987_s14 }
 0xd0f   : > { %p4070_p0 = pnand %p4069_p11, %p5191_p1 }
 0xd10   : > { %p4075_p5 = por %p4074_p3, %p4073_p7 }
 0xd11   : > { %p4071_p13 = pneg %p4070_p0 }
 0xd12   : > { %p4077_p12 = por %p4076_p8, %p4075_p5 }
 0xd14   : > { %p4078_p9 = pnand %p4077_p12, %p4071_p13 }
 0xd16   : > { %4081 = shalt.err (!%p4078_p9)
}
 0xd17   : > { %3757 = dma.vmem_to_hbm [thread:$0]  (%p5191_p1), %s3310_s24, 128, %s4987_s14, %s3296_s4  }
 0xd18 PF: > { %s5192_s5 = sld [smem:[#allocation28_spill]]  ;;  %s5193_s17 = sld [smem:[#allocation21_spill]] }
 0xd19   : > { %s5194_s3 = sld [smem:[#allocation35_spill]] }
 0xd1e   : > { %p3780_p2 = scmp.ge.s32.totalorder %s5192_s5, 2  ;;  %s3321_s30 = sand.u32 1, %s5193_s17  }
 0xd1f   : > { %p5195_p10 = scmp.ne.s32.totalorder %s5194_s3, 0  ;;  %s3322_s29 = scalar_lea.sflag [#allocation6], %s3321_s30 }
 0xd21   : > { %p3776_p4 = pnand %p3780_p2, %p5195_p10 }
 0xd23   : > { %4143 = dma.done.wait (!%p3776_p4), %s3322_s29, 128  }
 0xd24   : > { %4145 = vsyncadd (!%p3776_p4), %s3322_s29, 4294967168  ;;  %s38_s0 = sadd.s32 1, %s5192_s5   ;;  %s5196_s21 = sld [smem:[#allocation19_spill]] }
 0xd25   : > { %p35_p6 = scmp.ge.s32.totalorder %s38_s0, 6   ;;  %s5197_s22 = sld [smem:[#allocation20_spill]] }
 0xd26   : > { %s5198_s23 = sld [smem:[#allocation31_spill]]  ;;  %s5199_s24 = sld [smem:[#allocation22_spill]] }
 0xd27   : > { %s5200_s25 = sld [smem:[#allocation23_spill]]  ;;  %s5201_s26 = sld [smem:[#allocation32_spill]] }
 0xd28   : > { %s5202_s27 = sld [smem:[#allocation26_spill]]  ;;  %s5203_s28 = sld [smem:[#allocation27_spill]] }
 0xd29   : > { %s5204_s29 = sld [smem:[#allocation29_spill]]  ;;  %s5205_s30 = sld [smem:[#allocation30_spill]] }
 0xd2a   :  { %37 = sbr.rel (!%p35_p6) target bundleno = 31 (0x1f), region = 218 }
 0xd31   :  { %3327 = vsyncpa [#allocation5], 1 }
 0xd32   :  { %3329 = vsyncpa [#allocation5 + $0x1], 1 }
 0xd33   :  { %3330 = vsyncpa [#allocation8], 1 }
 0xd34   :  { %3332 = vsyncpa [#allocation8 + $0x1], 1 }
 0xd35   :  { %3333 = vsyncpa [#allocation11], 1 }
 0xd36   :  { %3335 = vsyncpa [#allocation11 + $0x1], 1 }
 0xd37   :  { %3336 = vsyncpa [#allocation6], 1 }
 0xd38   :  { %3338 = vsyncpa [#allocation6 + $0x1], 1 }

</bundles_post_ra>
